<compile_context>
chip_gen: v7x
topology: tpu7x:2x2x1
jax: 0.10.0
libtpu: 0.0.40
codegen_flags: <defaults>
</compile_context>

<pallas_src>
import functools

import jax
import jax.numpy as jnp
from jax.experimental import pallas as pl
from jax.experimental.pallas import tpu as pltpu
import numpy as np


LANE = 128


def _round_up(x, m):
    return ((x + m - 1) // m) * m


def _mode_tile(S):
    # Retained Fourier modes processed per grid step.  64 amortizes the
    # ~0.35 us per-step pipeline overhead against the (now de-padded, bf16,
    # de-duplicated) per-mode weight DMA while keeping the double-buffered VMEM
    # footprint at a few MiB even for realistic FNO widths.
    return max(1, min(64, S))


def _vmem_limit_bytes(tile_s, mp, k, n):
    """Double-buffered pipeline footprint, accounting for internal (sublane,lane)
    VMEM layout padding, plus headroom for compiler scratch."""
    def tile_bytes(rows, cols, sub, dbytes):
        return _round_up(rows, sub) * _round_up(cols, LANE) * dbytes
    per_step = tile_s * (tile_bytes(mp, k, 16, 2)      # x   (bf16)
                         + tile_bytes(k, n, 16, 2)     # w   (bf16)
                         + tile_bytes(mp, n, 8, 4))    # out (f32)
    return int(min(64 * 1024 * 1024,
                   max(8 * 1024 * 1024, 2 * per_step + 2 * 1024 * 1024)))


# ----------------------------------------------------------------------------
# Pallas kernel: per-mode real matmul (== complex channel contraction)
# ----------------------------------------------------------------------------
def _make_spectral_kernel(tile_s):
    def kernel(x_ref, w_ref, o_ref):
        # x_ref : (tile_s, Mp, Cin)     bf16, rows = [Re(x) ; Im(x)] (zero padded)
        # w_ref : (tile_s, Cin, 2*Cout) bf16, cols = [Wr | Wi]
        # o_ref : (tile_s, Mp, 2*Cout)  f32
        # Fully unrolled static loop of 2-D MXU matmuls (no batched dot_general,
        # so no hidden per-mode retile/copy; clean MXU push/pop cadence).
        for s in range(tile_s):
            o_ref[s] = jnp.dot(x_ref[s], w_ref[s],
                               preferred_element_type=jnp.float32)
    return kernel


# ----------------------------------------------------------------------------
# Weight packing (hoisted out of the per-forward path; done once at init)
# ----------------------------------------------------------------------------
def pack_spectral_weights(weights1, weights2):
    """Half-packed bf16 weights [Wr | Wi], shape (S_pad, Cin, 2*Cout).

    Only the non-redundant half of the real-matmul operand is stored in HBM
    (the kernel stacks Re/Im of the activations along the matmul M dim, so the
    [[-Wi],[Wr]] bottom block is never materialized), and no 128-lane padding
    is applied: the weight stream is the dominant HBM traffic of the kernel.
    """
    w = jnp.stack([weights1, weights2], axis=0)               # (2, Cin, Cout, m1, m2)
    _, Cin, Cout, m1, m2 = w.shape
    S = 2 * m1 * m2
    wm = jnp.transpose(w, (0, 3, 4, 1, 2)).reshape(S, Cin, Cout)
    wp = jnp.concatenate(
        [jnp.real(wm), jnp.imag(wm)], axis=-1).astype(jnp.float32)  # (S, Cin, 2*Cout)

    tile_s = _mode_tile(S)
    S_pad = pl.cdiv(S, tile_s) * tile_s
    wp = jnp.pad(wp, ((0, S_pad - S), (0, 0), (0, 0)))
    return wp.astype(jnp.bfloat16)


# ----------------------------------------------------------------------------
# SpectralConv2d forward (Pallas hot path)
# ----------------------------------------------------------------------------
@functools.partial(jax.jit, static_argnames=("out_channels", "modes1", "modes2"))
def spectral_conv2d_forward(x, w_packed, *, out_channels, modes1, modes2):
    """SpectralConv2d forward. x: (B, Cin, H, W) float32 (NCHW)."""
    B, Cin, H, W = x.shape
    Cout = out_channels

    # TODO(synk): rfft2 / irfft2 have no Pallas primitive; they stay in XLA.
    x_ft = jnp.fft.rfft2(x)                                   # (B, Cin, H, Wf) c64
    Wf = x_ft.shape[-1]

    x_low = x_ft[:, :, :modes1, :modes2]
    x_high = x_ft[:, :, H - modes1:, :modes2]
    xs = jnp.stack([x_low, x_high], axis=0)                    # (2, B, Cin, m1, m2) c64

    S = 2 * modes1 * modes2
    # Re/Im are stacked along the matmul M dim: per mode the packed activation
    # is [[Re(x)], [Im(x)]] of shape (2B, Cin).  One real matmul against the
    # half-packed [Wr | Wi] yields all four partial products xr@Wr, xr@Wi,
    # xi@Wr, xi@Wi of the complex contraction.
    x_ri = jnp.stack([jnp.real(xs), jnp.imag(xs)], axis=1)     # (2, ri, B, Cin, m1, m2)
    xm = jnp.transpose(x_ri, (0, 4, 5, 1, 2, 3)).reshape(S, 2 * B, Cin)

    tile_s = _mode_tile(S)
    S_pad = pl.cdiv(S, tile_s) * tile_s
    Mp = _round_up(2 * B, 16)                                  # bf16 sublane pack
    N = 2 * Cout
    assert w_packed.shape == (S_pad, Cin, N), (w_packed.shape, (S_pad, Cin, N))

    xp = jnp.pad(xm, ((0, S_pad - S), (0, Mp - 2 * B), (0, 0))).astype(jnp.bfloat16)

    out = pl.pallas_call(
        _make_spectral_kernel(tile_s),
        out_shape=jax.ShapeDtypeStruct((S_pad, Mp, N), jnp.float32),
        grid_spec=pltpu.PrefetchScalarGridSpec(
            num_scalar_prefetch=0,
            grid=(S_pad // tile_s,),
            # Blocks keep the true (unpadded) channel dims: the last two block
            # dims equal the full array extents so the (8,128) rule is satisfied
            # without inflating the dominant weight DMA stream.
            in_specs=[
                pl.BlockSpec((tile_s, Mp, Cin), lambda s: (s, 0, 0)),
                pl.BlockSpec((tile_s, Cin, N), lambda s: (s, 0, 0)),
            ],
            out_specs=pl.BlockSpec((tile_s, Mp, N), lambda s: (s, 0, 0)),
        ),
        compiler_params=pltpu.CompilerParams(
            # Disjoint output slices per grid step.
            # TODO(synk): try pltpu.CORE_PARALLEL on v7x (2 TCs) and
            # pipeline_mode=pl.Buffered(3) on the weight spec once a trace shows
            # exposed DMA waits at realistic sizes.
            dimension_semantics=("parallel",),
            vmem_limit_bytes=_vmem_limit_bytes(tile_s, Mp, Cin, N),
        ),
    )(xp, w_packed)

    out = out[:S, :2 * B, :]
    p_re = out[:, :B, :]                                       # [xr@Wr | xr@Wi]
    p_im = out[:, B:, :]                                       # [xi@Wr | xi@Wi]
    yr = p_re[..., :Cout] - p_im[..., Cout:]
    yi = p_re[..., Cout:] + p_im[..., :Cout]
    out_c = (yr + 1j * yi).astype(jnp.complex64)               # (S, B, Cout)
    out_modes = out_c.reshape(2, modes1, modes2, B, Cout).transpose(0, 3, 4, 1, 2)

    out_ft = jnp.zeros((B, Cout, H, Wf), dtype=jnp.complex64)
    out_ft = out_ft.at[:, :, :modes1, :modes2].set(out_modes[0])
    out_ft = out_ft.at[:, :, H - modes1:, :modes2].set(out_modes[1])

    return jnp.fft.irfft2(out_ft, s=(H, W)).astype(jnp.float32)


# ----------------------------------------------------------------------------
# Pure-JAX reference (mirrors the PyTorch SpectralConv2d exactly)
# ----------------------------------------------------------------------------
def _spectral_conv2d_reference(x, w1, w2, modes1, modes2):
    B, C, H, W = x.shape
    x_ft = jnp.fft.rfft2(x)
    Wf = x_ft.shape[-1]
    out_ft = jnp.zeros((B, w1.shape[1], H, Wf), dtype=jnp.complex64)
    out_ft = out_ft.at[:, :, :modes1, :modes2].set(
        jnp.einsum('bixy,ioxy->boxy', x_ft[:, :, :modes1, :modes2], w1))
    out_ft = out_ft.at[:, :, H - modes1:, :modes2].set(
        jnp.einsum('bixy,ioxy->boxy', x_ft[:, :, H - modes1:, :modes2], w2))
    return jnp.fft.irfft2(out_ft, s=(H, W)).astype(jnp.float32)


# ----------------------------------------------------------------------------
# Full FNO2D forward (spectral convs via Pallas; small fc / 1x1-conv glue in JAX)
# ----------------------------------------------------------------------------
@functools.partial(jax.jit, static_argnames=("modes1", "modes2", "use_pallas"))
def fno2d_forward(x, params, *, modes1, modes2, use_pallas=True):
    """FNO2D forward. x: (B, H, W, 3) float32 -> (B, H, W, 1) float32."""
    width = params["fc0_w"].shape[1]
    h = x @ params["fc0_w"] + params["fc0_b"]                  # fc0
    h = jnp.transpose(h, (0, 3, 1, 2))                         # (B, width, H, W)
    for i in range(4):
        if use_pallas:
            spec = spectral_conv2d_forward(
                h, params[f"conv{i}_packed"],
                out_channels=width, modes1=modes1, modes2=modes2)
        else:
            spec = _spectral_conv2d_reference(
                h, params[f"conv{i}_w1"], params[f"conv{i}_w2"], modes1, modes2)
        pw = (jnp.einsum("bchw,oc->bohw", h, params[f"w{i}_w"])
              + params[f"w{i}_b"][None, :, None, None])        # 1x1 conv
        h = spec + pw
        if i < 3:
            h = jax.nn.relu(h)
    h = jnp.transpose(h, (0, 2, 3, 1))                         # (B, H, W, width)
    h = jax.nn.relu(h @ params["fc1_w"] + params["fc1_b"])
    h = h @ params["fc2_w"] + params["fc2_b"]
    return h


def init_fno2d_params(key, *, modes1, modes2, width):
    ks = iter(jax.random.split(key, 32))

    def nrm(shape, scale=1.0):
        return scale * jax.random.normal(next(ks), shape, dtype=jnp.float32)

    params = {}
    params["fc0_w"] = nrm((3, width), 1.0 / np.sqrt(3.0))
    params["fc0_b"] = nrm((width,), 0.1)
    spec_scale = 1.0 / (width * width)
    for i in range(4):
        w1 = spec_scale * (nrm((width, width, modes1, modes2))
                           + 1j * nrm((width, width, modes1, modes2)))
        w2 = spec_scale * (nrm((width, width, modes1, modes2))
                           + 1j * nrm((width, width, modes1, modes2)))
        params[f"conv{i}_w1"] = w1.astype(jnp.complex64)
        params[f"conv{i}_w2"] = w2.astype(jnp.complex64)
        # Packed half-layout (bf16, de-padded), hoisted out of the forward path.
        params[f"conv{i}_packed"] = pack_spectral_weights(
            params[f"conv{i}_w1"], params[f"conv{i}_w2"])
        params[f"w{i}_w"] = nrm((width, width), 1.0 / np.sqrt(width))
        params[f"w{i}_b"] = nrm((width,), 0.1)
    params["fc1_w"] = nrm((width, 128), 1.0 / np.sqrt(width))
    params["fc1_b"] = nrm((128,), 0.1)
    params["fc2_w"] = nrm((128, 1), 1.0 / np.sqrt(128.0))
    params["fc2_b"] = nrm((1,), 0.1)
    return params


if __name__ == "__main__":
    B, H, W = 2, 16, 16
    width = 8
    modes1 = modes2 = 4

    key = jax.random.PRNGKey(0)
    k_in, k_par = jax.random.split(key)
    params = init_fno2d_params(k_par, modes1=modes1, modes2=modes2, width=width)

    # 1) Standalone check of the Pallas SpectralConv2d against the pure-JAX
    #    reference.  Tolerances account for the bf16 weight/activation stream
    #    (f32 MXU accumulation).
    xc = jax.random.normal(jax.random.PRNGKey(1), (B, width, H, W), dtype=jnp.float32)
    out_spec = jax.block_until_ready(
        spectral_conv2d_forward(xc, params["conv0_packed"],
                                out_channels=width, modes1=modes1, modes2=modes2))
    ref_spec = _spectral_conv2d_reference(
        xc, params["conv0_w1"], params["conv0_w2"], modes1, modes2)
    np.testing.assert_allclose(np.asarray(out_spec), np.asarray(ref_spec),
                               rtol=2e-2, atol=5e-3)
    assert out_spec.shape == (B, width, H, W) and out_spec.dtype == jnp.float32

    # 2) Full FNO2D forward (Pallas spectral convs) vs pure-JAX reference.
    x = jax.random.normal(k_in, (B, H, W, 3), dtype=jnp.float32)
    out = jax.block_until_ready(
        fno2d_forward(x, params, modes1=modes1, modes2=modes2, use_pallas=True))
    ref = fno2d_forward(x, params, modes1=modes1, modes2=modes2, use_pallas=False)
    np.testing.assert_allclose(np.asarray(out), np.asarray(ref), rtol=2e-2, atol=2e-2)
    assert out.shape == (B, H, W, 1) and out.dtype == jnp.float32

    print("KERNEL_OK")
</pallas_src>

<mosaic_0001>
module attributes {stable_mosaic.version = 11 : i64} {
  func.func @kernel(%arg0: i32, %arg1: memref<32x16x8xbf16, #tpu.memory_space<vmem>>, %arg2: memref<32x8x16xbf16, #tpu.memory_space<vmem>>, %arg3: memref<32x16x16xf32, #tpu.memory_space<vmem>>) attributes {dimension_semantics = [#tpu.dimension_semantics<parallel>], iteration_bounds = array<i64: 1>, scalar_prefetch = 0 : i64, scratch_operands = 0 : i64, tpu.core_type = #tpu.core_type<tc>, window_params = [{transform_indices = @transform_0, window_bounds = array<i64: 32, 16, 8>}, {transform_indices = @transform_1, window_bounds = array<i64: 32, 8, 16>}, {transform_indices = @transform_2, window_bounds = array<i64: 32, 16, 16>}]} {
    %c0 = arith.constant 0 : index
    %c0_0 = arith.constant 0 : index
    %c0_1 = arith.constant 0 : index
    %0 = vector.load %arg1[%c0, %c0_0, %c0_1] : memref<32x16x8xbf16, #tpu.memory_space<vmem>>, vector<1x16x8xbf16>
    %1 = vector.shape_cast %0 : vector<1x16x8xbf16> to vector<16x8xbf16>
    %c0_2 = arith.constant 0 : index
    %c0_3 = arith.constant 0 : index
    %c0_4 = arith.constant 0 : index
    %2 = vector.load %arg2[%c0_2, %c0_3, %c0_4] : memref<32x8x16xbf16, #tpu.memory_space<vmem>>, vector<1x8x16xbf16>
    %3 = vector.shape_cast %2 : vector<1x8x16xbf16> to vector<8x16xbf16>
    %cst = arith.constant dense<0.000000e+00> : vector<16x16xf32>
    %4 = tpu.matmul %1, %3, %cst {dimension_numbers = #tpu.dot_dimension_numbers<[1], [0], [0], [1], [0, 0, 1, 1], [], []>} : vector<16x8xbf16>, vector<8x16xbf16>, vector<16x16xf32> -> vector<16x16xf32>
    %c0_5 = arith.constant 0 : index
    %c0_6 = arith.constant 0 : index
    %c0_7 = arith.constant 0 : index
    %5 = vector.load %arg3[%c0_5, %c0_6, %c0_7] : memref<32x16x16xf32, #tpu.memory_space<vmem>>, vector<1x16x16xf32>
    %6 = vector.shape_cast %5 : vector<1x16x16xf32> to vector<16x16xf32>
    %7 = vector.shape_cast %4 : vector<16x16xf32> to vector<1x16x16xf32>
    tpu.vector_store %arg3[%c0_5, %c0_6, %c0_7], %7 {strides = array<i32>} : memref<32x16x16xf32, #tpu.memory_space<vmem>>, vector<1x16x16xf32>,
    %c1 = arith.constant 1 : index
    %c0_8 = arith.constant 0 : index
    %c0_9 = arith.constant 0 : index
    %8 = vector.load %arg1[%c1, %c0_8, %c0_9] : memref<32x16x8xbf16, #tpu.memory_space<vmem>>, vector<1x16x8xbf16>
    %9 = vector.shape_cast %8 : vector<1x16x8xbf16> to vector<16x8xbf16>
    %c1_10 = arith.constant 1 : index
    %c0_11 = arith.constant 0 : index
    %c0_12 = arith.constant 0 : index
    %10 = vector.load %arg2[%c1_10, %c0_11, %c0_12] : memref<32x8x16xbf16, #tpu.memory_space<vmem>>, vector<1x8x16xbf16>
    %11 = vector.shape_cast %10 : vector<1x8x16xbf16> to vector<8x16xbf16>
    %cst_13 = arith.constant dense<0.000000e+00> : vector<16x16xf32>
    %12 = tpu.matmul %9, %11, %cst_13 {dimension_numbers = #tpu.dot_dimension_numbers<[1], [0], [0], [1], [0, 0, 1, 1], [], []>} : vector<16x8xbf16>, vector<8x16xbf16>, vector<16x16xf32> -> vector<16x16xf32>
    %c1_14 = arith.constant 1 : index
    %c0_15 = arith.constant 0 : index
    %c0_16 = arith.constant 0 : index
    %13 = vector.load %arg3[%c1_14, %c0_15, %c0_16] : memref<32x16x16xf32, #tpu.memory_space<vmem>>, vector<1x16x16xf32>
    %14 = vector.shape_cast %13 : vector<1x16x16xf32> to vector<16x16xf32>
    %15 = vector.shape_cast %12 : vector<16x16xf32> to vector<1x16x16xf32>
    tpu.vector_store %arg3[%c1_14, %c0_15, %c0_16], %15 {strides = array<i32>} : memref<32x16x16xf32, #tpu.memory_space<vmem>>, vector<1x16x16xf32>,
    %c2 = arith.constant 2 : index
    %c0_17 = arith.constant 0 : index
    %c0_18 = arith.constant 0 : index
    %16 = vector.load %arg1[%c2, %c0_17, %c0_18] : memref<32x16x8xbf16, #tpu.memory_space<vmem>>, vector<1x16x8xbf16>
    %17 = vector.shape_cast %16 : vector<1x16x8xbf16> to vector<16x8xbf16>
    %c2_19 = arith.constant 2 : index
    %c0_20 = arith.constant 0 : index
    %c0_21 = arith.constant 0 : index
    %18 = vector.load %arg2[%c2_19, %c0_20, %c0_21] : memref<32x8x16xbf16, #tpu.memory_space<vmem>>, vector<1x8x16xbf16>
    %19 = vector.shape_cast %18 : vector<1x8x16xbf16> to vector<8x16xbf16>
    %cst_22 = arith.constant dense<0.000000e+00> : vector<16x16xf32>
    %20 = tpu.matmul %17, %19, %cst_22 {dimension_numbers = #tpu.dot_dimension_numbers<[1], [0], [0], [1], [0, 0, 1, 1], [], []>} : vector<16x8xbf16>, vector<8x16xbf16>, vector<16x16xf32> -> vector<16x16xf32>
    %c2_23 = arith.constant 2 : index
    %c0_24 = arith.constant 0 : index
    %c0_25 = arith.constant 0 : index
    %21 = vector.load %arg3[%c2_23, %c0_24, %c0_25] : memref<32x16x16xf32, #tpu.memory_space<vmem>>, vector<1x16x16xf32>
    %22 = vector.shape_cast %21 : vector<1x16x16xf32> to vector<16x16xf32>
    %23 = vector.shape_cast %20 : vector<16x16xf32> to vector<1x16x16xf32>
    tpu.vector_store %arg3[%c2_23, %c0_24, %c0_25], %23 {strides = array<i32>} : memref<32x16x16xf32, #tpu.memory_space<vmem>>, vector<1x16x16xf32>,
    %c3 = arith.constant 3 : index
    %c0_26 = arith.constant 0 : index
    %c0_27 = arith.constant 0 : index
    %24 = vector.load %arg1[%c3, %c0_26, %c0_27] : memref<32x16x8xbf16, #tpu.memory_space<vmem>>, vector<1x16x8xbf16>
    %25 = vector.shape_cast %24 : vector<1x16x8xbf16> to vector<16x8xbf16>
    %c3_28 = arith.constant 3 : index
    %c0_29 = arith.constant 0 : index
    %c0_30 = arith.constant 0 : index
    %26 = vector.load %arg2[%c3_28, %c0_29, %c0_30] : memref<32x8x16xbf16, #tpu.memory_space<vmem>>, vector<1x8x16xbf16>
    %27 = vector.shape_cast %26 : vector<1x8x16xbf16> to vector<8x16xbf16>
    %cst_31 = arith.constant dense<0.000000e+00> : vector<16x16xf32>
    %28 = tpu.matmul %25, %27, %cst_31 {dimension_numbers = #tpu.dot_dimension_numbers<[1], [0], [0], [1], [0, 0, 1, 1], [], []>} : vector<16x8xbf16>, vector<8x16xbf16>, vector<16x16xf32> -> vector<16x16xf32>
    %c3_32 = arith.constant 3 : index
    %c0_33 = arith.constant 0 : index
    %c0_34 = arith.constant 0 : index
    %29 = vector.load %arg3[%c3_32, %c0_33, %c0_34] : memref<32x16x16xf32, #tpu.memory_space<vmem>>, vector<1x16x16xf32>
    %30 = vector.shape_cast %29 : vector<1x16x16xf32> to vector<16x16xf32>
    %31 = vector.shape_cast %28 : vector<16x16xf32> to vector<1x16x16xf32>
    tpu.vector_store %arg3[%c3_32, %c0_33, %c0_34], %31 {strides = array<i32>} : memref<32x16x16xf32, #tpu.memory_space<vmem>>, vector<1x16x16xf32>,
    %c4 = arith.constant 4 : index
    %c0_35 = arith.constant 0 : index
    %c0_36 = arith.constant 0 : index
    %32 = vector.load %arg1[%c4, %c0_35, %c0_36] : memref<32x16x8xbf16, #tpu.memory_space<vmem>>, vector<1x16x8xbf16>
    %33 = vector.shape_cast %32 : vector<1x16x8xbf16> to vector<16x8xbf16>
    %c4_37 = arith.constant 4 : index
    %c0_38 = arith.constant 0 : index
    %c0_39 = arith.constant 0 : index
    %34 = vector.load %arg2[%c4_37, %c0_38, %c0_39] : memref<32x8x16xbf16, #tpu.memory_space<vmem>>, vector<1x8x16xbf16>
    %35 = vector.shape_cast %34 : vector<1x8x16xbf16> to vector<8x16xbf16>
    %cst_40 = arith.constant dense<0.000000e+00> : vector<16x16xf32>
    %36 = tpu.matmul %33, %35, %cst_40 {dimension_numbers = #tpu.dot_dimension_numbers<[1], [0], [0], [1], [0, 0, 1, 1], [], []>} : vector<16x8xbf16>, vector<8x16xbf16>, vector<16x16xf32> -> vector<16x16xf32>
    %c4_41 = arith.constant 4 : index
    %c0_42 = arith.constant 0 : index
    %c0_43 = arith.constant 0 : index
    %37 = vector.load %arg3[%c4_41, %c0_42, %c0_43] : memref<32x16x16xf32, #tpu.memory_space<vmem>>, vector<1x16x16xf32>
    %38 = vector.shape_cast %37 : vector<1x16x16xf32> to vector<16x16xf32>
    %39 = vector.shape_cast %36 : vector<16x16xf32> to vector<1x16x16xf32>
    tpu.vector_store %arg3[%c4_41, %c0_42, %c0_43], %39 {strides = array<i32>} : memref<32x16x16xf32, #tpu.memory_space<vmem>>, vector<1x16x16xf32>,
    %c5 = arith.constant 5 : index
    %c0_44 = arith.constant 0 : index
    %c0_45 = arith.constant 0 : index
    %40 = vector.load %arg1[%c5, %c0_44, %c0_45] : memref<32x16x8xbf16, #tpu.memory_space<vmem>>, vector<1x16x8xbf16>
    %41 = vector.shape_cast %40 : vector<1x16x8xbf16> to vector<16x8xbf16>
    %c5_46 = arith.constant 5 : index
    %c0_47 = arith.constant 0 : index
    %c0_48 = arith.constant 0 : index
    %42 = vector.load %arg2[%c5_46, %c0_47, %c0_48] : memref<32x8x16xbf16, #tpu.memory_space<vmem>>, vector<1x8x16xbf16>
    %43 = vector.shape_cast %42 : vector<1x8x16xbf16> to vector<8x16xbf16>
    %cst_49 = arith.constant dense<0.000000e+00> : vector<16x16xf32>
    %44 = tpu.matmul %41, %43, %cst_49 {dimension_numbers = #tpu.dot_dimension_numbers<[1], [0], [0], [1], [0, 0, 1, 1], [], []>} : vector<16x8xbf16>, vector<8x16xbf16>, vector<16x16xf32> -> vector<16x16xf32>
    %c5_50 = arith.constant 5 : index
    %c0_51 = arith.constant 0 : index
    %c0_52 = arith.constant 0 : index
    %45 = vector.load %arg3[%c5_50, %c0_51, %c0_52] : memref<32x16x16xf32, #tpu.memory_space<vmem>>, vector<1x16x16xf32>
    %46 = vector.shape_cast %45 : vector<1x16x16xf32> to vector<16x16xf32>
    %47 = vector.shape_cast %44 : vector<16x16xf32> to vector<1x16x16xf32>
    tpu.vector_store %arg3[%c5_50, %c0_51, %c0_52], %47 {strides = array<i32>} : memref<32x16x16xf32, #tpu.memory_space<vmem>>, vector<1x16x16xf32>,
    %c6 = arith.constant 6 : index
    %c0_53 = arith.constant 0 : index
    %c0_54 = arith.constant 0 : index
    %48 = vector.load %arg1[%c6, %c0_53, %c0_54] : memref<32x16x8xbf16, #tpu.memory_space<vmem>>, vector<1x16x8xbf16>
    %49 = vector.shape_cast %48 : vector<1x16x8xbf16> to vector<16x8xbf16>
    %c6_55 = arith.constant 6 : index
    %c0_56 = arith.constant 0 : index
    %c0_57 = arith.constant 0 : index
    %50 = vector.load %arg2[%c6_55, %c0_56, %c0_57] : memref<32x8x16xbf16, #tpu.memory_space<vmem>>, vector<1x8x16xbf16>
    %51 = vector.shape_cast %50 : vector<1x8x16xbf16> to vector<8x16xbf16>
    %cst_58 = arith.constant dense<0.000000e+00> : vector<16x16xf32>
    %52 = tpu.matmul %49, %51, %cst_58 {dimension_numbers = #tpu.dot_dimension_numbers<[1], [0], [0], [1], [0, 0, 1, 1], [], []>} : vector<16x8xbf16>, vector<8x16xbf16>, vector<16x16xf32> -> vector<16x16xf32>
    %c6_59 = arith.constant 6 : index
    %c0_60 = arith.constant 0 : index
    %c0_61 = arith.constant 0 : index
    %53 = vector.load %arg3[%c6_59, %c0_60, %c0_61] : memref<32x16x16xf32, #tpu.memory_space<vmem>>, vector<1x16x16xf32>
    %54 = vector.shape_cast %53 : vector<1x16x16xf32> to vector<16x16xf32>
    %55 = vector.shape_cast %52 : vector<16x16xf32> to vector<1x16x16xf32>
    tpu.vector_store %arg3[%c6_59, %c0_60, %c0_61], %55 {strides = array<i32>} : memref<32x16x16xf32, #tpu.memory_space<vmem>>, vector<1x16x16xf32>,
    %c7 = arith.constant 7 : index
    %c0_62 = arith.constant 0 : index
    %c0_63 = arith.constant 0 : index
    %56 = vector.load %arg1[%c7, %c0_62, %c0_63] : memref<32x16x8xbf16, #tpu.memory_space<vmem>>, vector<1x16x8xbf16>
    %57 = vector.shape_cast %56 : vector<1x16x8xbf16> to vector<16x8xbf16>
    %c7_64 = arith.constant 7 : index
    %c0_65 = arith.constant 0 : index
    %c0_66 = arith.constant 0 : index
    %58 = vector.load %arg2[%c7_64, %c0_65, %c0_66] : memref<32x8x16xbf16, #tpu.memory_space<vmem>>, vector<1x8x16xbf16>
    %59 = vector.shape_cast %58 : vector<1x8x16xbf16> to vector<8x16xbf16>
    %cst_67 = arith.constant dense<0.000000e+00> : vector<16x16xf32>
    %60 = tpu.matmul %57, %59, %cst_67 {dimension_numbers = #tpu.dot_dimension_numbers<[1], [0], [0], [1], [0, 0, 1, 1], [], []>} : vector<16x8xbf16>, vector<8x16xbf16>, vector<16x16xf32> -> vector<16x16xf32>
    %c7_68 = arith.constant 7 : index
    %c0_69 = arith.constant 0 : index
    %c0_70 = arith.constant 0 : index
    %61 = vector.load %arg3[%c7_68, %c0_69, %c0_70] : memref<32x16x16xf32, #tpu.memory_space<vmem>>, vector<1x16x16xf32>
    %62 = vector.shape_cast %61 : vector<1x16x16xf32> to vector<16x16xf32>
    %63 = vector.shape_cast %60 : vector<16x16xf32> to vector<1x16x16xf32>
    tpu.vector_store %arg3[%c7_68, %c0_69, %c0_70], %63 {strides = array<i32>} : memref<32x16x16xf32, #tpu.memory_space<vmem>>, vector<1x16x16xf32>,
    %c8 = arith.constant 8 : index
    %c0_71 = arith.constant 0 : index
    %c0_72 = arith.constant 0 : index
    %64 = vector.load %arg1[%c8, %c0_71, %c0_72] : memref<32x16x8xbf16, #tpu.memory_space<vmem>>, vector<1x16x8xbf16>
    %65 = vector.shape_cast %64 : vector<1x16x8xbf16> to vector<16x8xbf16>
    %c8_73 = arith.constant 8 : index
    %c0_74 = arith.constant 0 : index
    %c0_75 = arith.constant 0 : index
    %66 = vector.load %arg2[%c8_73, %c0_74, %c0_75] : memref<32x8x16xbf16, #tpu.memory_space<vmem>>, vector<1x8x16xbf16>
    %67 = vector.shape_cast %66 : vector<1x8x16xbf16> to vector<8x16xbf16>
    %cst_76 = arith.constant dense<0.000000e+00> : vector<16x16xf32>
    %68 = tpu.matmul %65, %67, %cst_76 {dimension_numbers = #tpu.dot_dimension_numbers<[1], [0], [0], [1], [0, 0, 1, 1], [], []>} : vector<16x8xbf16>, vector<8x16xbf16>, vector<16x16xf32> -> vector<16x16xf32>
    %c8_77 = arith.constant 8 : index
    %c0_78 = arith.constant 0 : index
    %c0_79 = arith.constant 0 : index
    %69 = vector.load %arg3[%c8_77, %c0_78, %c0_79] : memref<32x16x16xf32, #tpu.memory_space<vmem>>, vector<1x16x16xf32>
    %70 = vector.shape_cast %69 : vector<1x16x16xf32> to vector<16x16xf32>
    %71 = vector.shape_cast %68 : vector<16x16xf32> to vector<1x16x16xf32>
    tpu.vector_store %arg3[%c8_77, %c0_78, %c0_79], %71 {strides = array<i32>} : memref<32x16x16xf32, #tpu.memory_space<vmem>>, vector<1x16x16xf32>,
    %c9 = arith.constant 9 : index
    %c0_80 = arith.constant 0 : index
    %c0_81 = arith.constant 0 : index
    %72 = vector.load %arg1[%c9, %c0_80, %c0_81] : memref<32x16x8xbf16, #tpu.memory_space<vmem>>, vector<1x16x8xbf16>
    %73 = vector.shape_cast %72 : vector<1x16x8xbf16> to vector<16x8xbf16>
    %c9_82 = arith.constant 9 : index
    %c0_83 = arith.constant 0 : index
    %c0_84 = arith.constant 0 : index
    %74 = vector.load %arg2[%c9_82, %c0_83, %c0_84] : memref<32x8x16xbf16, #tpu.memory_space<vmem>>, vector<1x8x16xbf16>
    %75 = vector.shape_cast %74 : vector<1x8x16xbf16> to vector<8x16xbf16>
    %cst_85 = arith.constant dense<0.000000e+00> : vector<16x16xf32>
    %76 = tpu.matmul %73, %75, %cst_85 {dimension_numbers = #tpu.dot_dimension_numbers<[1], [0], [0], [1], [0, 0, 1, 1], [], []>} : vector<16x8xbf16>, vector<8x16xbf16>, vector<16x16xf32> -> vector<16x16xf32>
    %c9_86 = arith.constant 9 : index
    %c0_87 = arith.constant 0 : index
    %c0_88 = arith.constant 0 : index
    %77 = vector.load %arg3[%c9_86, %c0_87, %c0_88] : memref<32x16x16xf32, #tpu.memory_space<vmem>>, vector<1x16x16xf32>
    %78 = vector.shape_cast %77 : vector<1x16x16xf32> to vector<16x16xf32>
    %79 = vector.shape_cast %76 : vector<16x16xf32> to vector<1x16x16xf32>
    tpu.vector_store %arg3[%c9_86, %c0_87, %c0_88], %79 {strides = array<i32>} : memref<32x16x16xf32, #tpu.memory_space<vmem>>, vector<1x16x16xf32>,
    %c10 = arith.constant 10 : index
    %c0_89 = arith.constant 0 : index
    %c0_90 = arith.constant 0 : index
    %80 = vector.load %arg1[%c10, %c0_89, %c0_90] : memref<32x16x8xbf16, #tpu.memory_space<vmem>>, vector<1x16x8xbf16>
    %81 = vector.shape_cast %80 : vector<1x16x8xbf16> to vector<16x8xbf16>
    %c10_91 = arith.constant 10 : index
    %c0_92 = arith.constant 0 : index
    %c0_93 = arith.constant 0 : index
    %82 = vector.load %arg2[%c10_91, %c0_92, %c0_93] : memref<32x8x16xbf16, #tpu.memory_space<vmem>>, vector<1x8x16xbf16>
    %83 = vector.shape_cast %82 : vector<1x8x16xbf16> to vector<8x16xbf16>
    %cst_94 = arith.constant dense<0.000000e+00> : vector<16x16xf32>
    %84 = tpu.matmul %81, %83, %cst_94 {dimension_numbers = #tpu.dot_dimension_numbers<[1], [0], [0], [1], [0, 0, 1, 1], [], []>} : vector<16x8xbf16>, vector<8x16xbf16>, vector<16x16xf32> -> vector<16x16xf32>
    %c10_95 = arith.constant 10 : index
    %c0_96 = arith.constant 0 : index
    %c0_97 = arith.constant 0 : index
    %85 = vector.load %arg3[%c10_95, %c0_96, %c0_97] : memref<32x16x16xf32, #tpu.memory_space<vmem>>, vector<1x16x16xf32>
    %86 = vector.shape_cast %85 : vector<1x16x16xf32> to vector<16x16xf32>
    %87 = vector.shape_cast %84 : vector<16x16xf32> to vector<1x16x16xf32>
    tpu.vector_store %arg3[%c10_95, %c0_96, %c0_97], %87 {strides = array<i32>} : memref<32x16x16xf32, #tpu.memory_space<vmem>>, vector<1x16x16xf32>,
    %c11 = arith.constant 11 : index
    %c0_98 = arith.constant 0 : index
    %c0_99 = arith.constant 0 : index
    %88 = vector.load %arg1[%c11, %c0_98, %c0_99] : memref<32x16x8xbf16, #tpu.memory_space<vmem>>, vector<1x16x8xbf16>
    %89 = vector.shape_cast %88 : vector<1x16x8xbf16> to vector<16x8xbf16>
    %c11_100 = arith.constant 11 : index
    %c0_101 = arith.constant 0 : index
    %c0_102 = arith.constant 0 : index
    %90 = vector.load %arg2[%c11_100, %c0_101, %c0_102] : memref<32x8x16xbf16, #tpu.memory_space<vmem>>, vector<1x8x16xbf16>
    %91 = vector.shape_cast %90 : vector<1x8x16xbf16> to vector<8x16xbf16>
    %cst_103 = arith.constant dense<0.000000e+00> : vector<16x16xf32>
    %92 = tpu.matmul %89, %91, %cst_103 {dimension_numbers = #tpu.dot_dimension_numbers<[1], [0], [0], [1], [0, 0, 1, 1], [], []>} : vector<16x8xbf16>, vector<8x16xbf16>, vector<16x16xf32> -> vector<16x16xf32>
    %c11_104 = arith.constant 11 : index
    %c0_105 = arith.constant 0 : index
    %c0_106 = arith.constant 0 : index
    %93 = vector.load %arg3[%c11_104, %c0_105, %c0_106] : memref<32x16x16xf32, #tpu.memory_space<vmem>>, vector<1x16x16xf32>
    %94 = vector.shape_cast %93 : vector<1x16x16xf32> to vector<16x16xf32>
    %95 = vector.shape_cast %92 : vector<16x16xf32> to vector<1x16x16xf32>
    tpu.vector_store %arg3[%c11_104, %c0_105, %c0_106], %95 {strides = array<i32>} : memref<32x16x16xf32, #tpu.memory_space<vmem>>, vector<1x16x16xf32>,
    %c12 = arith.constant 12 : index
    %c0_107 = arith.constant 0 : index
    %c0_108 = arith.constant 0 : index
    %96 = vector.load %arg1[%c12, %c0_107, %c0_108] : memref<32x16x8xbf16, #tpu.memory_space<vmem>>, vector<1x16x8xbf16>
    %97 = vector.shape_cast %96 : vector<1x16x8xbf16> to vector<16x8xbf16>
    %c12_109 = arith.constant 12 : index
    %c0_110 = arith.constant 0 : index
    %c0_111 = arith.constant 0 : index
    %98 = vector.load %arg2[%c12_109, %c0_110, %c0_111] : memref<32x8x16xbf16, #tpu.memory_space<vmem>>, vector<1x8x16xbf16>
    %99 = vector.shape_cast %98 : vector<1x8x16xbf16> to vector<8x16xbf16>
    %cst_112 = arith.constant dense<0.000000e+00> : vector<16x16xf32>
    %100 = tpu.matmul %97, %99, %cst_112 {dimension_numbers = #tpu.dot_dimension_numbers<[1], [0], [0], [1], [0, 0, 1, 1], [], []>} : vector<16x8xbf16>, vector<8x16xbf16>, vector<16x16xf32> -> vector<16x16xf32>
    %c12_113 = arith.constant 12 : index
    %c0_114 = arith.constant 0 : index
    %c0_115 = arith.constant 0 : index
    %101 = vector.load %arg3[%c12_113, %c0_114, %c0_115] : memref<32x16x16xf32, #tpu.memory_space<vmem>>, vector<1x16x16xf32>
    %102 = vector.shape_cast %101 : vector<1x16x16xf32> to vector<16x16xf32>
    %103 = vector.shape_cast %100 : vector<16x16xf32> to vector<1x16x16xf32>
    tpu.vector_store %arg3[%c12_113, %c0_114, %c0_115], %103 {strides = array<i32>} : memref<32x16x16xf32, #tpu.memory_space<vmem>>, vector<1x16x16xf32>,
    %c13 = arith.constant 13 : index
    %c0_116 = arith.constant 0 : index
    %c0_117 = arith.constant 0 : index
    %104 = vector.load %arg1[%c13, %c0_116, %c0_117] : memref<32x16x8xbf16, #tpu.memory_space<vmem>>, vector<1x16x8xbf16>
    %105 = vector.shape_cast %104 : vector<1x16x8xbf16> to vector<16x8xbf16>
    %c13_118 = arith.constant 13 : index
    %c0_119 = arith.constant 0 : index
    %c0_120 = arith.constant 0 : index
    %106 = vector.load %arg2[%c13_118, %c0_119, %c0_120] : memref<32x8x16xbf16, #tpu.memory_space<vmem>>, vector<1x8x16xbf16>
    %107 = vector.shape_cast %106 : vector<1x8x16xbf16> to vector<8x16xbf16>
    %cst_121 = arith.constant dense<0.000000e+00> : vector<16x16xf32>
    %108 = tpu.matmul %105, %107, %cst_121 {dimension_numbers = #tpu.dot_dimension_numbers<[1], [0], [0], [1], [0, 0, 1, 1], [], []>} : vector<16x8xbf16>, vector<8x16xbf16>, vector<16x16xf32> -> vector<16x16xf32>
    %c13_122 = arith.constant 13 : index
    %c0_123 = arith.constant 0 : index
    %c0_124 = arith.constant 0 : index
    %109 = vector.load %arg3[%c13_122, %c0_123, %c0_124] : memref<32x16x16xf32, #tpu.memory_space<vmem>>, vector<1x16x16xf32>
    %110 = vector.shape_cast %109 : vector<1x16x16xf32> to vector<16x16xf32>
    %111 = vector.shape_cast %108 : vector<16x16xf32> to vector<1x16x16xf32>
    tpu.vector_store %arg3[%c13_122, %c0_123, %c0_124], %111 {strides = array<i32>} : memref<32x16x16xf32, #tpu.memory_space<vmem>>, vector<1x16x16xf32>,
    %c14 = arith.constant 14 : index
    %c0_125 = arith.constant 0 : index
    %c0_126 = arith.constant 0 : index
    %112 = vector.load %arg1[%c14, %c0_125, %c0_126] : memref<32x16x8xbf16, #tpu.memory_space<vmem>>, vector<1x16x8xbf16>
    %113 = vector.shape_cast %112 : vector<1x16x8xbf16> to vector<16x8xbf16>
    %c14_127 = arith.constant 14 : index
    %c0_128 = arith.constant 0 : index
    %c0_129 = arith.constant 0 : index
    %114 = vector.load %arg2[%c14_127, %c0_128, %c0_129] : memref<32x8x16xbf16, #tpu.memory_space<vmem>>, vector<1x8x16xbf16>
    %115 = vector.shape_cast %114 : vector<1x8x16xbf16> to vector<8x16xbf16>
    %cst_130 = arith.constant dense<0.000000e+00> : vector<16x16xf32>
    %116 = tpu.matmul %113, %115, %cst_130 {dimension_numbers = #tpu.dot_dimension_numbers<[1], [0], [0], [1], [0, 0, 1, 1], [], []>} : vector<16x8xbf16>, vector<8x16xbf16>, vector<16x16xf32> -> vector<16x16xf32>
    %c14_131 = arith.constant 14 : index
    %c0_132 = arith.constant 0 : index
    %c0_133 = arith.constant 0 : index
    %117 = vector.load %arg3[%c14_131, %c0_132, %c0_133] : memref<32x16x16xf32, #tpu.memory_space<vmem>>, vector<1x16x16xf32>
    %118 = vector.shape_cast %117 : vector<1x16x16xf32> to vector<16x16xf32>
    %119 = vector.shape_cast %116 : vector<16x16xf32> to vector<1x16x16xf32>
    tpu.vector_store %arg3[%c14_131, %c0_132, %c0_133], %119 {strides = array<i32>} : memref<32x16x16xf32, #tpu.memory_space<vmem>>, vector<1x16x16xf32>,
    %c15 = arith.constant 15 : index
    %c0_134 = arith.constant 0 : index
    %c0_135 = arith.constant 0 : index
    %120 = vector.load %arg1[%c15, %c0_134, %c0_135] : memref<32x16x8xbf16, #tpu.memory_space<vmem>>, vector<1x16x8xbf16>
    %121 = vector.shape_cast %120 : vector<1x16x8xbf16> to vector<16x8xbf16>
    %c15_136 = arith.constant 15 : index
    %c0_137 = arith.constant 0 : index
    %c0_138 = arith.constant 0 : index
    %122 = vector.load %arg2[%c15_136, %c0_137, %c0_138] : memref<32x8x16xbf16, #tpu.memory_space<vmem>>, vector<1x8x16xbf16>
    %123 = vector.shape_cast %122 : vector<1x8x16xbf16> to vector<8x16xbf16>
    %cst_139 = arith.constant dense<0.000000e+00> : vector<16x16xf32>
    %124 = tpu.matmul %121, %123, %cst_139 {dimension_numbers = #tpu.dot_dimension_numbers<[1], [0], [0], [1], [0, 0, 1, 1], [], []>} : vector<16x8xbf16>, vector<8x16xbf16>, vector<16x16xf32> -> vector<16x16xf32>
    %c15_140 = arith.constant 15 : index
    %c0_141 = arith.constant 0 : index
    %c0_142 = arith.constant 0 : index
    %125 = vector.load %arg3[%c15_140, %c0_141, %c0_142] : memref<32x16x16xf32, #tpu.memory_space<vmem>>, vector<1x16x16xf32>
    %126 = vector.shape_cast %125 : vector<1x16x16xf32> to vector<16x16xf32>
    %127 = vector.shape_cast %124 : vector<16x16xf32> to vector<1x16x16xf32>
    tpu.vector_store %arg3[%c15_140, %c0_141, %c0_142], %127 {strides = array<i32>} : memref<32x16x16xf32, #tpu.memory_space<vmem>>, vector<1x16x16xf32>,
    %c16 = arith.constant 16 : index
    %c0_143 = arith.constant 0 : index
    %c0_144 = arith.constant 0 : index
    %128 = vector.load %arg1[%c16, %c0_143, %c0_144] : memref<32x16x8xbf16, #tpu.memory_space<vmem>>, vector<1x16x8xbf16>
    %129 = vector.shape_cast %128 : vector<1x16x8xbf16> to vector<16x8xbf16>
    %c16_145 = arith.constant 16 : index
    %c0_146 = arith.constant 0 : index
    %c0_147 = arith.constant 0 : index
    %130 = vector.load %arg2[%c16_145, %c0_146, %c0_147] : memref<32x8x16xbf16, #tpu.memory_space<vmem>>, vector<1x8x16xbf16>
    %131 = vector.shape_cast %130 : vector<1x8x16xbf16> to vector<8x16xbf16>
    %cst_148 = arith.constant dense<0.000000e+00> : vector<16x16xf32>
    %132 = tpu.matmul %129, %131, %cst_148 {dimension_numbers = #tpu.dot_dimension_numbers<[1], [0], [0], [1], [0, 0, 1, 1], [], []>} : vector<16x8xbf16>, vector<8x16xbf16>, vector<16x16xf32> -> vector<16x16xf32>
    %c16_149 = arith.constant 16 : index
    %c0_150 = arith.constant 0 : index
    %c0_151 = arith.constant 0 : index
    %133 = vector.load %arg3[%c16_149, %c0_150, %c0_151] : memref<32x16x16xf32, #tpu.memory_space<vmem>>, vector<1x16x16xf32>
    %134 = vector.shape_cast %133 : vector<1x16x16xf32> to vector<16x16xf32>
    %135 = vector.shape_cast %132 : vector<16x16xf32> to vector<1x16x16xf32>
    tpu.vector_store %arg3[%c16_149, %c0_150, %c0_151], %135 {strides = array<i32>} : memref<32x16x16xf32, #tpu.memory_space<vmem>>, vector<1x16x16xf32>,
    %c17 = arith.constant 17 : index
    %c0_152 = arith.constant 0 : index
    %c0_153 = arith.constant 0 : index
    %136 = vector.load %arg1[%c17, %c0_152, %c0_153] : memref<32x16x8xbf16, #tpu.memory_space<vmem>>, vector<1x16x8xbf16>
    %137 = vector.shape_cast %136 : vector<1x16x8xbf16> to vector<16x8xbf16>
    %c17_154 = arith.constant 17 : index
    %c0_155 = arith.constant 0 : index
    %c0_156 = arith.constant 0 : index
    %138 = vector.load %arg2[%c17_154, %c0_155, %c0_156] : memref<32x8x16xbf16, #tpu.memory_space<vmem>>, vector<1x8x16xbf16>
    %139 = vector.shape_cast %138 : vector<1x8x16xbf16> to vector<8x16xbf16>
    %cst_157 = arith.constant dense<0.000000e+00> : vector<16x16xf32>
    %140 = tpu.matmul %137, %139, %cst_157 {dimension_numbers = #tpu.dot_dimension_numbers<[1], [0], [0], [1], [0, 0, 1, 1], [], []>} : vector<16x8xbf16>, vector<8x16xbf16>, vector<16x16xf32> -> vector<16x16xf32>
    %c17_158 = arith.constant 17 : index
    %c0_159 = arith.constant 0 : index
    %c0_160 = arith.constant 0 : index
    %141 = vector.load %arg3[%c17_158, %c0_159, %c0_160] : memref<32x16x16xf32, #tpu.memory_space<vmem>>, vector<1x16x16xf32>
    %142 = vector.shape_cast %141 : vector<1x16x16xf32> to vector<16x16xf32>
    %143 = vector.shape_cast %140 : vector<16x16xf32> to vector<1x16x16xf32>
    tpu.vector_store %arg3[%c17_158, %c0_159, %c0_160], %143 {strides = array<i32>} : memref<32x16x16xf32, #tpu.memory_space<vmem>>, vector<1x16x16xf32>,
    %c18 = arith.constant 18 : index
    %c0_161 = arith.constant 0 : index
    %c0_162 = arith.constant 0 : index
    %144 = vector.load %arg1[%c18, %c0_161, %c0_162] : memref<32x16x8xbf16, #tpu.memory_space<vmem>>, vector<1x16x8xbf16>
    %145 = vector.shape_cast %144 : vector<1x16x8xbf16> to vector<16x8xbf16>
    %c18_163 = arith.constant 18 : index
    %c0_164 = arith.constant 0 : index
    %c0_165 = arith.constant 0 : index
    %146 = vector.load %arg2[%c18_163, %c0_164, %c0_165] : memref<32x8x16xbf16, #tpu.memory_space<vmem>>, vector<1x8x16xbf16>
    %147 = vector.shape_cast %146 : vector<1x8x16xbf16> to vector<8x16xbf16>
    %cst_166 = arith.constant dense<0.000000e+00> : vector<16x16xf32>
    %148 = tpu.matmul %145, %147, %cst_166 {dimension_numbers = #tpu.dot_dimension_numbers<[1], [0], [0], [1], [0, 0, 1, 1], [], []>} : vector<16x8xbf16>, vector<8x16xbf16>, vector<16x16xf32> -> vector<16x16xf32>
    %c18_167 = arith.constant 18 : index
    %c0_168 = arith.constant 0 : index
    %c0_169 = arith.constant 0 : index
    %149 = vector.load %arg3[%c18_167, %c0_168, %c0_169] : memref<32x16x16xf32, #tpu.memory_space<vmem>>, vector<1x16x16xf32>
    %150 = vector.shape_cast %149 : vector<1x16x16xf32> to vector<16x16xf32>
    %151 = vector.shape_cast %148 : vector<16x16xf32> to vector<1x16x16xf32>
    tpu.vector_store %arg3[%c18_167, %c0_168, %c0_169], %151 {strides = array<i32>} : memref<32x16x16xf32, #tpu.memory_space<vmem>>, vector<1x16x16xf32>,
    %c19 = arith.constant 19 : index
    %c0_170 = arith.constant 0 : index
    %c0_171 = arith.constant 0 : index
    %152 = vector.load %arg1[%c19, %c0_170, %c0_171] : memref<32x16x8xbf16, #tpu.memory_space<vmem>>, vector<1x16x8xbf16>
    %153 = vector.shape_cast %152 : vector<1x16x8xbf16> to vector<16x8xbf16>
    %c19_172 = arith.constant 19 : index
    %c0_173 = arith.constant 0 : index
    %c0_174 = arith.constant 0 : index
    %154 = vector.load %arg2[%c19_172, %c0_173, %c0_174] : memref<32x8x16xbf16, #tpu.memory_space<vmem>>, vector<1x8x16xbf16>
    %155 = vector.shape_cast %154 : vector<1x8x16xbf16> to vector<8x16xbf16>
    %cst_175 = arith.constant dense<0.000000e+00> : vector<16x16xf32>
    %156 = tpu.matmul %153, %155, %cst_175 {dimension_numbers = #tpu.dot_dimension_numbers<[1], [0], [0], [1], [0, 0, 1, 1], [], []>} : vector<16x8xbf16>, vector<8x16xbf16>, vector<16x16xf32> -> vector<16x16xf32>
    %c19_176 = arith.constant 19 : index
    %c0_177 = arith.constant 0 : index
    %c0_178 = arith.constant 0 : index
    %157 = vector.load %arg3[%c19_176, %c0_177, %c0_178] : memref<32x16x16xf32, #tpu.memory_space<vmem>>, vector<1x16x16xf32>
    %158 = vector.shape_cast %157 : vector<1x16x16xf32> to vector<16x16xf32>
    %159 = vector.shape_cast %156 : vector<16x16xf32> to vector<1x16x16xf32>
    tpu.vector_store %arg3[%c19_176, %c0_177, %c0_178], %159 {strides = array<i32>} : memref<32x16x16xf32, #tpu.memory_space<vmem>>, vector<1x16x16xf32>,
    %c20 = arith.constant 20 : index
    %c0_179 = arith.constant 0 : index
    %c0_180 = arith.constant 0 : index
    %160 = vector.load %arg1[%c20, %c0_179, %c0_180] : memref<32x16x8xbf16, #tpu.memory_space<vmem>>, vector<1x16x8xbf16>
    %161 = vector.shape_cast %160 : vector<1x16x8xbf16> to vector<16x8xbf16>
    %c20_181 = arith.constant 20 : index
    %c0_182 = arith.constant 0 : index
    %c0_183 = arith.constant 0 : index
    %162 = vector.load %arg2[%c20_181, %c0_182, %c0_183] : memref<32x8x16xbf16, #tpu.memory_space<vmem>>, vector<1x8x16xbf16>
    %163 = vector.shape_cast %162 : vector<1x8x16xbf16> to vector<8x16xbf16>
    %cst_184 = arith.constant dense<0.000000e+00> : vector<16x16xf32>
    %164 = tpu.matmul %161, %163, %cst_184 {dimension_numbers = #tpu.dot_dimension_numbers<[1], [0], [0], [1], [0, 0, 1, 1], [], []>} : vector<16x8xbf16>, vector<8x16xbf16>, vector<16x16xf32> -> vector<16x16xf32>
    %c20_185 = arith.constant 20 : index
    %c0_186 = arith.constant 0 : index
    %c0_187 = arith.constant 0 : index
    %165 = vector.load %arg3[%c20_185, %c0_186, %c0_187] : memref<32x16x16xf32, #tpu.memory_space<vmem>>, vector<1x16x16xf32>
    %166 = vector.shape_cast %165 : vector<1x16x16xf32> to vector<16x16xf32>
    %167 = vector.shape_cast %164 : vector<16x16xf32> to vector<1x16x16xf32>
    tpu.vector_store %arg3[%c20_185, %c0_186, %c0_187], %167 {strides = array<i32>} : memref<32x16x16xf32, #tpu.memory_space<vmem>>, vector<1x16x16xf32>,
    %c21 = arith.constant 21 : index
    %c0_188 = arith.constant 0 : index
    %c0_189 = arith.constant 0 : index
    %168 = vector.load %arg1[%c21, %c0_188, %c0_189] : memref<32x16x8xbf16, #tpu.memory_space<vmem>>, vector<1x16x8xbf16>
    %169 = vector.shape_cast %168 : vector<1x16x8xbf16> to vector<16x8xbf16>
    %c21_190 = arith.constant 21 : index
    %c0_191 = arith.constant 0 : index
    %c0_192 = arith.constant 0 : index
    %170 = vector.load %arg2[%c21_190, %c0_191, %c0_192] : memref<32x8x16xbf16, #tpu.memory_space<vmem>>, vector<1x8x16xbf16>
    %171 = vector.shape_cast %170 : vector<1x8x16xbf16> to vector<8x16xbf16>
    %cst_193 = arith.constant dense<0.000000e+00> : vector<16x16xf32>
    %172 = tpu.matmul %169, %171, %cst_193 {dimension_numbers = #tpu.dot_dimension_numbers<[1], [0], [0], [1], [0, 0, 1, 1], [], []>} : vector<16x8xbf16>, vector<8x16xbf16>, vector<16x16xf32> -> vector<16x16xf32>
    %c21_194 = arith.constant 21 : index
    %c0_195 = arith.constant 0 : index
    %c0_196 = arith.constant 0 : index
    %173 = vector.load %arg3[%c21_194, %c0_195, %c0_196] : memref<32x16x16xf32, #tpu.memory_space<vmem>>, vector<1x16x16xf32>
    %174 = vector.shape_cast %173 : vector<1x16x16xf32> to vector<16x16xf32>
    %175 = vector.shape_cast %172 : vector<16x16xf32> to vector<1x16x16xf32>
    tpu.vector_store %arg3[%c21_194, %c0_195, %c0_196], %175 {strides = array<i32>} : memref<32x16x16xf32, #tpu.memory_space<vmem>>, vector<1x16x16xf32>,
    %c22 = arith.constant 22 : index
    %c0_197 = arith.constant 0 : index
    %c0_198 = arith.constant 0 : index
    %176 = vector.load %arg1[%c22, %c0_197, %c0_198] : memref<32x16x8xbf16, #tpu.memory_space<vmem>>, vector<1x16x8xbf16>
    %177 = vector.shape_cast %176 : vector<1x16x8xbf16> to vector<16x8xbf16>
    %c22_199 = arith.constant 22 : index
    %c0_200 = arith.constant 0 : index
    %c0_201 = arith.constant 0 : index
    %178 = vector.load %arg2[%c22_199, %c0_200, %c0_201] : memref<32x8x16xbf16, #tpu.memory_space<vmem>>, vector<1x8x16xbf16>
    %179 = vector.shape_cast %178 : vector<1x8x16xbf16> to vector<8x16xbf16>
    %cst_202 = arith.constant dense<0.000000e+00> : vector<16x16xf32>
    %180 = tpu.matmul %177, %179, %cst_202 {dimension_numbers = #tpu.dot_dimension_numbers<[1], [0], [0], [1], [0, 0, 1, 1], [], []>} : vector<16x8xbf16>, vector<8x16xbf16>, vector<16x16xf32> -> vector<16x16xf32>
    %c22_203 = arith.constant 22 : index
    %c0_204 = arith.constant 0 : index
    %c0_205 = arith.constant 0 : index
    %181 = vector.load %arg3[%c22_203, %c0_204, %c0_205] : memref<32x16x16xf32, #tpu.memory_space<vmem>>, vector<1x16x16xf32>
    %182 = vector.shape_cast %181 : vector<1x16x16xf32> to vector<16x16xf32>
    %183 = vector.shape_cast %180 : vector<16x16xf32> to vector<1x16x16xf32>
    tpu.vector_store %arg3[%c22_203, %c0_204, %c0_205], %183 {strides = array<i32>} : memref<32x16x16xf32, #tpu.memory_space<vmem>>, vector<1x16x16xf32>,
    %c23 = arith.constant 23 : index
    %c0_206 = arith.constant 0 : index
    %c0_207 = arith.constant 0 : index
    %184 = vector.load %arg1[%c23, %c0_206, %c0_207] : memref<32x16x8xbf16, #tpu.memory_space<vmem>>, vector<1x16x8xbf16>
    %185 = vector.shape_cast %184 : vector<1x16x8xbf16> to vector<16x8xbf16>
    %c23_208 = arith.constant 23 : index
    %c0_209 = arith.constant 0 : index
    %c0_210 = arith.constant 0 : index
    %186 = vector.load %arg2[%c23_208, %c0_209, %c0_210] : memref<32x8x16xbf16, #tpu.memory_space<vmem>>, vector<1x8x16xbf16>
    %187 = vector.shape_cast %186 : vector<1x8x16xbf16> to vector<8x16xbf16>
    %cst_211 = arith.constant dense<0.000000e+00> : vector<16x16xf32>
    %188 = tpu.matmul %185, %187, %cst_211 {dimension_numbers = #tpu.dot_dimension_numbers<[1], [0], [0], [1], [0, 0, 1, 1], [], []>} : vector<16x8xbf16>, vector<8x16xbf16>, vector<16x16xf32> -> vector<16x16xf32>
    %c23_212 = arith.constant 23 : index
    %c0_213 = arith.constant 0 : index
    %c0_214 = arith.constant 0 : index
    %189 = vector.load %arg3[%c23_212, %c0_213, %c0_214] : memref<32x16x16xf32, #tpu.memory_space<vmem>>, vector<1x16x16xf32>
    %190 = vector.shape_cast %189 : vector<1x16x16xf32> to vector<16x16xf32>
    %191 = vector.shape_cast %188 : vector<16x16xf32> to vector<1x16x16xf32>
    tpu.vector_store %arg3[%c23_212, %c0_213, %c0_214], %191 {strides = array<i32>} : memref<32x16x16xf32, #tpu.memory_space<vmem>>, vector<1x16x16xf32>,
    %c24 = arith.constant 24 : index
    %c0_215 = arith.constant 0 : index
    %c0_216 = arith.constant 0 : index
    %192 = vector.load %arg1[%c24, %c0_215, %c0_216] : memref<32x16x8xbf16, #tpu.memory_space<vmem>>, vector<1x16x8xbf16>
    %193 = vector.shape_cast %192 : vector<1x16x8xbf16> to vector<16x8xbf16>
    %c24_217 = arith.constant 24 : index
    %c0_218 = arith.constant 0 : index
    %c0_219 = arith.constant 0 : index
    %194 = vector.load %arg2[%c24_217, %c0_218, %c0_219] : memref<32x8x16xbf16, #tpu.memory_space<vmem>>, vector<1x8x16xbf16>
    %195 = vector.shape_cast %194 : vector<1x8x16xbf16> to vector<8x16xbf16>
    %cst_220 = arith.constant dense<0.000000e+00> : vector<16x16xf32>
    %196 = tpu.matmul %193, %195, %cst_220 {dimension_numbers = #tpu.dot_dimension_numbers<[1], [0], [0], [1], [0, 0, 1, 1], [], []>} : vector<16x8xbf16>, vector<8x16xbf16>, vector<16x16xf32> -> vector<16x16xf32>
    %c24_221 = arith.constant 24 : index
    %c0_222 = arith.constant 0 : index
    %c0_223 = arith.constant 0 : index
    %197 = vector.load %arg3[%c24_221, %c0_222, %c0_223] : memref<32x16x16xf32, #tpu.memory_space<vmem>>, vector<1x16x16xf32>
    %198 = vector.shape_cast %197 : vector<1x16x16xf32> to vector<16x16xf32>
    %199 = vector.shape_cast %196 : vector<16x16xf32> to vector<1x16x16xf32>
    tpu.vector_store %arg3[%c24_221, %c0_222, %c0_223], %199 {strides = array<i32>} : memref<32x16x16xf32, #tpu.memory_space<vmem>>, vector<1x16x16xf32>,
    %c25 = arith.constant 25 : index
    %c0_224 = arith.constant 0 : index
    %c0_225 = arith.constant 0 : index
    %200 = vector.load %arg1[%c25, %c0_224, %c0_225] : memref<32x16x8xbf16, #tpu.memory_space<vmem>>, vector<1x16x8xbf16>
    %201 = vector.shape_cast %200 : vector<1x16x8xbf16> to vector<16x8xbf16>
    %c25_226 = arith.constant 25 : index
    %c0_227 = arith.constant 0 : index
    %c0_228 = arith.constant 0 : index
    %202 = vector.load %arg2[%c25_226, %c0_227, %c0_228] : memref<32x8x16xbf16, #tpu.memory_space<vmem>>, vector<1x8x16xbf16>
    %203 = vector.shape_cast %202 : vector<1x8x16xbf16> to vector<8x16xbf16>
    %cst_229 = arith.constant dense<0.000000e+00> : vector<16x16xf32>
    %204 = tpu.matmul %201, %203, %cst_229 {dimension_numbers = #tpu.dot_dimension_numbers<[1], [0], [0], [1], [0, 0, 1, 1], [], []>} : vector<16x8xbf16>, vector<8x16xbf16>, vector<16x16xf32> -> vector<16x16xf32>
    %c25_230 = arith.constant 25 : index
    %c0_231 = arith.constant 0 : index
    %c0_232 = arith.constant 0 : index
    %205 = vector.load %arg3[%c25_230, %c0_231, %c0_232] : memref<32x16x16xf32, #tpu.memory_space<vmem>>, vector<1x16x16xf32>
    %206 = vector.shape_cast %205 : vector<1x16x16xf32> to vector<16x16xf32>
    %207 = vector.shape_cast %204 : vector<16x16xf32> to vector<1x16x16xf32>
    tpu.vector_store %arg3[%c25_230, %c0_231, %c0_232], %207 {strides = array<i32>} : memref<32x16x16xf32, #tpu.memory_space<vmem>>, vector<1x16x16xf32>,
    %c26 = arith.constant 26 : index
    %c0_233 = arith.constant 0 : index
    %c0_234 = arith.constant 0 : index
    %208 = vector.load %arg1[%c26, %c0_233, %c0_234] : memref<32x16x8xbf16, #tpu.memory_space<vmem>>, vector<1x16x8xbf16>
    %209 = vector.shape_cast %208 : vector<1x16x8xbf16> to vector<16x8xbf16>
    %c26_235 = arith.constant 26 : index
    %c0_236 = arith.constant 0 : index
    %c0_237 = arith.constant 0 : index
    %210 = vector.load %arg2[%c26_235, %c0_236, %c0_237] : memref<32x8x16xbf16, #tpu.memory_space<vmem>>, vector<1x8x16xbf16>
    %211 = vector.shape_cast %210 : vector<1x8x16xbf16> to vector<8x16xbf16>
    %cst_238 = arith.constant dense<0.000000e+00> : vector<16x16xf32>
    %212 = tpu.matmul %209, %211, %cst_238 {dimension_numbers = #tpu.dot_dimension_numbers<[1], [0], [0], [1], [0, 0, 1, 1], [], []>} : vector<16x8xbf16>, vector<8x16xbf16>, vector<16x16xf32> -> vector<16x16xf32>
    %c26_239 = arith.constant 26 : index
    %c0_240 = arith.constant 0 : index
    %c0_241 = arith.constant 0 : index
    %213 = vector.load %arg3[%c26_239, %c0_240, %c0_241] : memref<32x16x16xf32, #tpu.memory_space<vmem>>, vector<1x16x16xf32>
    %214 = vector.shape_cast %213 : vector<1x16x16xf32> to vector<16x16xf32>
    %215 = vector.shape_cast %212 : vector<16x16xf32> to vector<1x16x16xf32>
    tpu.vector_store %arg3[%c26_239, %c0_240, %c0_241], %215 {strides = array<i32>} : memref<32x16x16xf32, #tpu.memory_space<vmem>>, vector<1x16x16xf32>,
    %c27 = arith.constant 27 : index
    %c0_242 = arith.constant 0 : index
    %c0_243 = arith.constant 0 : index
    %216 = vector.load %arg1[%c27, %c0_242, %c0_243] : memref<32x16x8xbf16, #tpu.memory_space<vmem>>, vector<1x16x8xbf16>
    %217 = vector.shape_cast %216 : vector<1x16x8xbf16> to vector<16x8xbf16>
    %c27_244 = arith.constant 27 : index
    %c0_245 = arith.constant 0 : index
    %c0_246 = arith.constant 0 : index
    %218 = vector.load %arg2[%c27_244, %c0_245, %c0_246] : memref<32x8x16xbf16, #tpu.memory_space<vmem>>, vector<1x8x16xbf16>
    %219 = vector.shape_cast %218 : vector<1x8x16xbf16> to vector<8x16xbf16>
    %cst_247 = arith.constant dense<0.000000e+00> : vector<16x16xf32>
    %220 = tpu.matmul %217, %219, %cst_247 {dimension_numbers = #tpu.dot_dimension_numbers<[1], [0], [0], [1], [0, 0, 1, 1], [], []>} : vector<16x8xbf16>, vector<8x16xbf16>, vector<16x16xf32> -> vector<16x16xf32>
    %c27_248 = arith.constant 27 : index
    %c0_249 = arith.constant 0 : index
    %c0_250 = arith.constant 0 : index
    %221 = vector.load %arg3[%c27_248, %c0_249, %c0_250] : memref<32x16x16xf32, #tpu.memory_space<vmem>>, vector<1x16x16xf32>
    %222 = vector.shape_cast %221 : vector<1x16x16xf32> to vector<16x16xf32>
    %223 = vector.shape_cast %220 : vector<16x16xf32> to vector<1x16x16xf32>
    tpu.vector_store %arg3[%c27_248, %c0_249, %c0_250], %223 {strides = array<i32>} : memref<32x16x16xf32, #tpu.memory_space<vmem>>, vector<1x16x16xf32>,
    %c28 = arith.constant 28 : index
    %c0_251 = arith.constant 0 : index
    %c0_252 = arith.constant 0 : index
    %224 = vector.load %arg1[%c28, %c0_251, %c0_252] : memref<32x16x8xbf16, #tpu.memory_space<vmem>>, vector<1x16x8xbf16>
    %225 = vector.shape_cast %224 : vector<1x16x8xbf16> to vector<16x8xbf16>
    %c28_253 = arith.constant 28 : index
    %c0_254 = arith.constant 0 : index
    %c0_255 = arith.constant 0 : index
    %226 = vector.load %arg2[%c28_253, %c0_254, %c0_255] : memref<32x8x16xbf16, #tpu.memory_space<vmem>>, vector<1x8x16xbf16>
    %227 = vector.shape_cast %226 : vector<1x8x16xbf16> to vector<8x16xbf16>
    %cst_256 = arith.constant dense<0.000000e+00> : vector<16x16xf32>
    %228 = tpu.matmul %225, %227, %cst_256 {dimension_numbers = #tpu.dot_dimension_numbers<[1], [0], [0], [1], [0, 0, 1, 1], [], []>} : vector<16x8xbf16>, vector<8x16xbf16>, vector<16x16xf32> -> vector<16x16xf32>
    %c28_257 = arith.constant 28 : index
    %c0_258 = arith.constant 0 : index
    %c0_259 = arith.constant 0 : index
    %229 = vector.load %arg3[%c28_257, %c0_258, %c0_259] : memref<32x16x16xf32, #tpu.memory_space<vmem>>, vector<1x16x16xf32>
    %230 = vector.shape_cast %229 : vector<1x16x16xf32> to vector<16x16xf32>
    %231 = vector.shape_cast %228 : vector<16x16xf32> to vector<1x16x16xf32>
    tpu.vector_store %arg3[%c28_257, %c0_258, %c0_259], %231 {strides = array<i32>} : memref<32x16x16xf32, #tpu.memory_space<vmem>>, vector<1x16x16xf32>,
    %c29 = arith.constant 29 : index
    %c0_260 = arith.constant 0 : index
    %c0_261 = arith.constant 0 : index
    %232 = vector.load %arg1[%c29, %c0_260, %c0_261] : memref<32x16x8xbf16, #tpu.memory_space<vmem>>, vector<1x16x8xbf16>
    %233 = vector.shape_cast %232 : vector<1x16x8xbf16> to vector<16x8xbf16>
    %c29_262 = arith.constant 29 : index
    %c0_263 = arith.constant 0 : index
    %c0_264 = arith.constant 0 : index
    %234 = vector.load %arg2[%c29_262, %c0_263, %c0_264] : memref<32x8x16xbf16, #tpu.memory_space<vmem>>, vector<1x8x16xbf16>
    %235 = vector.shape_cast %234 : vector<1x8x16xbf16> to vector<8x16xbf16>
    %cst_265 = arith.constant dense<0.000000e+00> : vector<16x16xf32>
    %236 = tpu.matmul %233, %235, %cst_265 {dimension_numbers = #tpu.dot_dimension_numbers<[1], [0], [0], [1], [0, 0, 1, 1], [], []>} : vector<16x8xbf16>, vector<8x16xbf16>, vector<16x16xf32> -> vector<16x16xf32>
    %c29_266 = arith.constant 29 : index
    %c0_267 = arith.constant 0 : index
    %c0_268 = arith.constant 0 : index
    %237 = vector.load %arg3[%c29_266, %c0_267, %c0_268] : memref<32x16x16xf32, #tpu.memory_space<vmem>>, vector<1x16x16xf32>
    %238 = vector.shape_cast %237 : vector<1x16x16xf32> to vector<16x16xf32>
    %239 = vector.shape_cast %236 : vector<16x16xf32> to vector<1x16x16xf32>
    tpu.vector_store %arg3[%c29_266, %c0_267, %c0_268], %239 {strides = array<i32>} : memref<32x16x16xf32, #tpu.memory_space<vmem>>, vector<1x16x16xf32>,
    %c30 = arith.constant 30 : index
    %c0_269 = arith.constant 0 : index
    %c0_270 = arith.constant 0 : index
    %240 = vector.load %arg1[%c30, %c0_269, %c0_270] : memref<32x16x8xbf16, #tpu.memory_space<vmem>>, vector<1x16x8xbf16>
    %241 = vector.shape_cast %240 : vector<1x16x8xbf16> to vector<16x8xbf16>
    %c30_271 = arith.constant 30 : index
    %c0_272 = arith.constant 0 : index
    %c0_273 = arith.constant 0 : index
    %242 = vector.load %arg2[%c30_271, %c0_272, %c0_273] : memref<32x8x16xbf16, #tpu.memory_space<vmem>>, vector<1x8x16xbf16>
    %243 = vector.shape_cast %242 : vector<1x8x16xbf16> to vector<8x16xbf16>
    %cst_274 = arith.constant dense<0.000000e+00> : vector<16x16xf32>
    %244 = tpu.matmul %241, %243, %cst_274 {dimension_numbers = #tpu.dot_dimension_numbers<[1], [0], [0], [1], [0, 0, 1, 1], [], []>} : vector<16x8xbf16>, vector<8x16xbf16>, vector<16x16xf32> -> vector<16x16xf32>
    %c30_275 = arith.constant 30 : index
    %c0_276 = arith.constant 0 : index
    %c0_277 = arith.constant 0 : index
    %245 = vector.load %arg3[%c30_275, %c0_276, %c0_277] : memref<32x16x16xf32, #tpu.memory_space<vmem>>, vector<1x16x16xf32>
    %246 = vector.shape_cast %245 : vector<1x16x16xf32> to vector<16x16xf32>
    %247 = vector.shape_cast %244 : vector<16x16xf32> to vector<1x16x16xf32>
    tpu.vector_store %arg3[%c30_275, %c0_276, %c0_277], %247 {strides = array<i32>} : memref<32x16x16xf32, #tpu.memory_space<vmem>>, vector<1x16x16xf32>,
    %c31 = arith.constant 31 : index
    %c0_278 = arith.constant 0 : index
    %c0_279 = arith.constant 0 : index
    %248 = vector.load %arg1[%c31, %c0_278, %c0_279] : memref<32x16x8xbf16, #tpu.memory_space<vmem>>, vector<1x16x8xbf16>
    %249 = vector.shape_cast %248 : vector<1x16x8xbf16> to vector<16x8xbf16>
    %c31_280 = arith.constant 31 : index
    %c0_281 = arith.constant 0 : index
    %c0_282 = arith.constant 0 : index
    %250 = vector.load %arg2[%c31_280, %c0_281, %c0_282] : memref<32x8x16xbf16, #tpu.memory_space<vmem>>, vector<1x8x16xbf16>
    %251 = vector.shape_cast %250 : vector<1x8x16xbf16> to vector<8x16xbf16>
    %cst_283 = arith.constant dense<0.000000e+00> : vector<16x16xf32>
    %252 = tpu.matmul %249, %251, %cst_283 {dimension_numbers = #tpu.dot_dimension_numbers<[1], [0], [0], [1], [0, 0, 1, 1], [], []>} : vector<16x8xbf16>, vector<8x16xbf16>, vector<16x16xf32> -> vector<16x16xf32>
    %c31_284 = arith.constant 31 : index
    %c0_285 = arith.constant 0 : index
    %c0_286 = arith.constant 0 : index
    %253 = vector.load %arg3[%c31_284, %c0_285, %c0_286] : memref<32x16x16xf32, #tpu.memory_space<vmem>>, vector<1x16x16xf32>
    %254 = vector.shape_cast %253 : vector<1x16x16xf32> to vector<16x16xf32>
    %255 = vector.shape_cast %252 : vector<16x16xf32> to vector<1x16x16xf32>
    tpu.vector_store %arg3[%c31_284, %c0_285, %c0_286], %255 {strides = array<i32>} : memref<32x16x16xf32, #tpu.memory_space<vmem>>, vector<1x16x16xf32>,
    return
  }
  func.func @transform_0(%arg0: i32) -> (i32, i32, i32) {
    %c0_i32 = arith.constant 0 : i32
    %c0_i32_0 = arith.constant 0 : i32
    %c0_i32_1 = arith.constant 0 : i32
    return %arg0, %c0_i32, %c0_i32_0 : i32, i32, i32
  }
  func.func @transform_1(%arg0: i32) -> (i32, i32, i32) {
    %c0_i32 = arith.constant 0 : i32
    %c0_i32_0 = arith.constant 0 : i32
    %c0_i32_1 = arith.constant 0 : i32
    return %arg0, %c0_i32, %c0_i32_0 : i32, i32, i32
  }
  func.func @transform_2(%arg0: i32) -> (i32, i32, i32) {
    %c0_i32 = arith.constant 0 : i32
    %c0_i32_0 = arith.constant 0 : i32
    %c0_i32_1 = arith.constant 0 : i32
    return %arg0, %c0_i32, %c0_i32_0 : i32, i32, i32
  }
}

</mosaic_0001>

<bundles_post_ra>
// kernel: reverse.1
= control target key start
LH: loop header
LB: loop body
LE: loop exit
PB: predicated region body
PF: predicated region fallthrough
CT: control target
= control target key end

     0   :  { %v103_v3 = vlaneseq  ;;  %v96_v18 = vld [vmem:[#allocation0 + $0x7] ss:$-1 sm:$0xff]  ;;  %v110_v19 = vld [vmem:[#allocation0 + $0x17] ss:$-1 sm:$0xff]  ;;  %s604_s0 = inlined_call_operand.vmem [shape: f32[2,8,16,7], index: 0, kind: input, shape index: {}]   ;;  %s605_s1 = inlined_call_operand.vmem [shape: f32[2,8,16,7], index: 1, kind: output, shape index: {}]  }
   0x1   :  { %v60_v0 = vld [vmem:[%s604_s0] sm:$0xff]  ;;  %v62_v1 = vld [vmem:[%s604_s0 + $0x8] sm:$0xff]  ;;  %v64_v2 = vld [vmem:[%s604_s0 + $0x10] sm:$0xff]  ;;  %v97_v20 = vrot.slane %v96_v18, 1  ;;  %v111_v21 = vrot.slane %v110_v19, 1 }
   0x2   :  { %61 = vst [vmem:[#allocation0 + $0x8] sm:$0xff] %v60_v0  ;;  %63 = vst [vmem:[#allocation0 + $0x18] sm:$0xff] %v62_v1  ;;  %v66_v4 = vld [vmem:[%s604_s0 + $0x18] sm:$0xff]  ;;  %v68_v5 = vld [vmem:[%s604_s0 + $0x20] sm:$0xff]  ;;  %v500_v10 = vshrl.u32 %v103_v3, 7 }
   0x3   :  { %65 = vst [vmem:[#allocation0 + $0x28] sm:$0xff] %v64_v2  ;;  %v70_v6 = vld [vmem:[%s604_s0 + $0x28] sm:$0xff]  ;;  %67 = vst [vmem:[#allocation0 + $0x38] sm:$0xff] %v66_v4  ;;  %v72_v7 = vld [vmem:[%s604_s0 + $0x30] sm:$0xff] }
   0x4   :  { %69 = vst [vmem:[#allocation0 + $0x48] sm:$0xff] %v68_v5  ;;  %71 = vst [vmem:[#allocation0 + $0x58] sm:$0xff] %v70_v6  ;;  %v74_v8 = vld [vmem:[%s604_s0 + $0x38] sm:$0xff]  ;;  %v76_v9 = vld [vmem:[%s604_s0 + $0x40] sm:$0xff]  ;;  %vm105_vm0 = vcmp.lt.s32.totalorder %v500_v10, 7 }
   0x5   :  { %73 = vst [vmem:[#allocation0 + $0x68] sm:$0xff] %v72_v7  ;;  %75 = vst [vmem:[#allocation0 + $0x78] sm:$0xff] %v74_v8  ;;  %v78_v11 = vld [vmem:[%s604_s0 + $0x48] sm:$0xff]  ;;  %v80_v12 = vld [vmem:[%s604_s0 + $0x50] sm:$0xff] }
   0x6   :  { %77 = vst [vmem:[#allocation0 + $0x88] sm:$0xff] %v76_v9  ;;  %v82_v13 = vld [vmem:[%s604_s0 + $0x58] sm:$0xff]  ;;  %79 = vst [vmem:[#allocation0 + $0x98] sm:$0xff] %v78_v11  ;;  %v84_v14 = vld [vmem:[%s604_s0 + $0x60] sm:$0xff] }
   0x7   :  { %81 = vst [vmem:[#allocation0 + $0xa8] sm:$0xff] %v80_v12  ;;  %83 = vst [vmem:[#allocation0 + $0xb8] sm:$0xff] %v82_v13  ;;  %v86_v15 = vld [vmem:[%s604_s0 + $0x68] sm:$0xff]  ;;  %v88_v16 = vld [vmem:[%s604_s0 + $0x70] sm:$0xff] }
   0x8   :  { %85 = vst [vmem:[#allocation0 + $0xc8] sm:$0xff] %v84_v14  ;;  %87 = vst [vmem:[#allocation0 + $0xd8] sm:$0xff] %v86_v15  ;;  %v90_v17 = vld [vmem:[%s604_s0 + $0x78] sm:$0xff]  ;;  %v124_v22 = vld [vmem:[#allocation0 + $0x27] ss:$-1 sm:$0xff] }
   0x9   :  { %89 = vst [vmem:[#allocation0 + $0xe8] sm:$0xff] %v88_v16  ;;  %91 = vst [vmem:[#allocation0 + $0xf8] sm:$0xff] %v90_v17  ;;  %v138_v23 = vld [vmem:[#allocation0 + $0x37] ss:$-1 sm:$0xff]  ;;  %v125_v24 = vrot.slane %v124_v22, 1 }
   0xa   :  { %v139_v25 = vrot.slane %v138_v23, 1  ;;  %v152_v26 = vld [vmem:[#allocation0 + $0x47] ss:$-1 sm:$0xff]  ;;  %v166_v27 = vld [vmem:[#allocation0 + $0x57] ss:$-1 sm:$0xff]  ;;  %98 = vst [vmem:[#allocation1] sm:$0xff] %v97_v20 }
   0xb   :  { %v101_v28 = vld [vmem:[#allocation0 + $0xf] ss:$-1 sm:$0xff]  ;;  %112 = vst [vmem:[#allocation1 + $0x8] sm:$0xff] %v111_v21  ;;  %v115_v29 = vld [vmem:[#allocation0 + $0x1f] ss:$-1 sm:$0xff]  ;;  %126 = vst [vmem:[#allocation1 + $0x10] sm:$0xff] %v125_v24 }
   0xc   :  { %v129_v30 = vld [vmem:[#allocation0 + $0x2f] ss:$-1 sm:$0xff]  ;;  %v102_v31 = vrot.slane %v101_v28, 1  ;;  %v116_v32 = vrot.slane %v115_v29, 1  ;;  %140 = vst [vmem:[#allocation1 + $0x18] sm:$0xff] %v139_v25  ;;  %v153_v35 = vrot.slane %v152_v26, 1 }
   0xd   :  { %v130_v33 = vrot.slane %v129_v30, 1  ;;  %v143_v34 = vld [vmem:[#allocation0 + $0x3f] ss:$-1 sm:$0xff]  ;;  %v157_v37 = vld [vmem:[#allocation0 + $0x4f] ss:$-1 sm:$0xff]  ;;  %v167_v38 = vrot.slane %v166_v27, 1 }
   0xe   :  { %v144_v36 = vrot.slane %v143_v34, 1  ;;  %v171_v39 = vld [vmem:[#allocation0 + $0x5f] ss:$-1 sm:$0xff]  ;;  %106 = vst.msk [vmem:[#allocation1] sm:$0xff] %vm105_vm0, %v102_v31  ;;  %120 = vst.msk [vmem:[#allocation1 + $0x8] sm:$0xff] %vm105_vm0, %v116_v32  ;;  %v158_v40 = vrot.slane %v157_v37, 1 }
   0xf   :  { %134 = vst.msk [vmem:[#allocation1 + $0x10] sm:$0xff] %vm105_vm0, %v130_v33  ;;  %154 = vst [vmem:[#allocation1 + $0x20] sm:$0xff] %v153_v35  ;;  %v172_v41 = vrot.slane %v171_v39, 1  ;;  %v180_v42 = vld [vmem:[#allocation0 + $0x67] ss:$-1 sm:$0xff] }
  0x10   :  { %v185_v43 = vld [vmem:[#allocation0 + $0x6f] ss:$-1 sm:$0xff]  ;;  %148 = vst.msk [vmem:[#allocation1 + $0x18] sm:$0xff] %vm105_vm0, %v144_v36  ;;  %168 = vst [vmem:[#allocation1 + $0x28] sm:$0xff] %v167_v38  ;;  %v181_v44 = vrot.slane %v180_v42, 1 }
  0x11   :  { %v186_v45 = vrot.slane %v185_v43, 1  ;;  %v194_v46 = vld [vmem:[#allocation0 + $0x77] ss:$-1 sm:$0xff]  ;;  %v199_v47 = vld [vmem:[#allocation0 + $0x7f] ss:$-1 sm:$0xff]  ;;  %162 = vst.msk [vmem:[#allocation1 + $0x20] sm:$0xff] %vm105_vm0, %v158_v40 }
  0x12   :  { %176 = vst.msk [vmem:[#allocation1 + $0x28] sm:$0xff] %vm105_vm0, %v172_v41  ;;  %v195_v48 = vrot.slane %v194_v46, 1  ;;  %v200_v49 = vrot.slane %v199_v47, 1  ;;  %v208_v50 = vld [vmem:[#allocation0 + $0x87] ss:$-1 sm:$0xff]  ;;  %182 = vst [vmem:[#allocation1 + $0x30] sm:$0xff] %v181_v44 }
  0x13   :  { %v213_v51 = vld [vmem:[#allocation0 + $0x8f] ss:$-1 sm:$0xff]  ;;  %v209_v52 = vrot.slane %v208_v50, 1  ;;  %v222_v54 = vld [vmem:[#allocation0 + $0x97] ss:$-1 sm:$0xff]  ;;  %190 = vst.msk [vmem:[#allocation1 + $0x30] sm:$0xff] %vm105_vm0, %v186_v45 }
  0x14   :  { %v214_v53 = vrot.slane %v213_v51, 1  ;;  %v227_v55 = vld [vmem:[#allocation0 + $0x9f] ss:$-1 sm:$0xff]  ;;  %196 = vst [vmem:[#allocation1 + $0x38] sm:$0xff] %v195_v48  ;;  %v223_v56 = vrot.slane %v222_v54, 1 }
  0x15   :  { %v228_v57 = vrot.slane %v227_v55, 1  ;;  %v236_v58 = vld [vmem:[#allocation0 + $0xa7] ss:$-1 sm:$0xff]  ;;  %v241_v59 = vld [vmem:[#allocation0 + $0xaf] ss:$-1 sm:$0xff]  ;;  %204 = vst.msk [vmem:[#allocation1 + $0x38] sm:$0xff] %vm105_vm0, %v200_v49 }
  0x16   :  { %210 = vst [vmem:[#allocation1 + $0x40] sm:$0xff] %v209_v52  ;;  %v237_v60 = vrot.slane %v236_v58, 1  ;;  %v242_v61 = vrot.slane %v241_v59, 1  ;;  %v250_v62 = vld [vmem:[#allocation0 + $0xb7] ss:$-1 sm:$0xff]  ;;  %224 = vst [vmem:[#allocation1 + $0x48] sm:$0xff] %v223_v56 }
  0x17   :  { %v255_v63 = vld [vmem:[#allocation0 + $0xbf] ss:$-1 sm:$0xff]  ;;  %218 = vst.msk [vmem:[#allocation1 + $0x40] sm:$0xff] %vm105_vm0, %v214_v53  ;;  %v251_v0 = vrot.slane %v250_v62, 1  ;;  %v264_v2 = vld [vmem:[#allocation0 + $0xc7] ss:$-1 sm:$0xff] }
  0x18   :  { %v256_v1 = vrot.slane %v255_v63, 1  ;;  %v269_v3 = vld [vmem:[#allocation0 + $0xcf] ss:$-1 sm:$0xff]  ;;  %232 = vst.msk [vmem:[#allocation1 + $0x48] sm:$0xff] %vm105_vm0, %v228_v57  ;;  %238 = vst [vmem:[#allocation1 + $0x50] sm:$0xff] %v237_v60  ;;  %v265_v4 = vrot.slane %v264_v2, 1 }
  0x19   :  { %v270_v5 = vrot.slane %v269_v3, 1  ;;  %v278_v6 = vld [vmem:[#allocation0 + $0xd7] ss:$-1 sm:$0xff]  ;;  %v283_v7 = vld [vmem:[#allocation0 + $0xdf] ss:$-1 sm:$0xff]  ;;  %246 = vst.msk [vmem:[#allocation1 + $0x50] sm:$0xff] %vm105_vm0, %v242_v61 }
  0x1a   :  { %252 = vst [vmem:[#allocation1 + $0x58] sm:$0xff] %v251_v0  ;;  %v279_v8 = vrot.slane %v278_v6, 1  ;;  %v284_v9 = vrot.slane %v283_v7, 1  ;;  %v292_v11 = vld [vmem:[#allocation0 + $0xe7] ss:$-1 sm:$0xff]  ;;  %266 = vst [vmem:[#allocation1 + $0x60] sm:$0xff] %v265_v4 }
  0x1b   :  { %v297_v12 = vld [vmem:[#allocation0 + $0xef] ss:$-1 sm:$0xff]  ;;  %260 = vst.msk [vmem:[#allocation1 + $0x58] sm:$0xff] %vm105_vm0, %v256_v1  ;;  %v293_v13 = vrot.slane %v292_v11, 1  ;;  %v306_v15 = vld [vmem:[#allocation0 + $0xf7] ss:$-1 sm:$0xff] }
  0x1c   :  { %v298_v14 = vrot.slane %v297_v12, 1  ;;  %v311_v16 = vld [vmem:[#allocation0 + $0xff] ss:$-1 sm:$0xff]  ;;  %274 = vst.msk [vmem:[#allocation1 + $0x60] sm:$0xff] %vm105_vm0, %v270_v5  ;;  %280 = vst [vmem:[#allocation1 + $0x68] sm:$0xff] %v279_v8  ;;  %v307_v17 = vrot.slane %v306_v15, 1 }
  0x1d   :  { %v312_v18 = vrot.slane %v311_v16, 1  ;;  %v374_v19 = vld [vmem:[#allocation1] sm:$0xff]  ;;  %v376_v20 = vld [vmem:[#allocation1 + $0x8] sm:$0xff]  ;;  %v378_v21 = vld [vmem:[#allocation1 + $0x10] sm:$0xff]  ;;  %288 = vst.msk [vmem:[#allocation1 + $0x68] sm:$0xff] %vm105_vm0, %v284_v9 }
  0x1e   :  { %294 = vst [vmem:[#allocation1 + $0x70] sm:$0xff] %v293_v13  ;;  %375 = vst [vmem:[%s605_s1] sm:$0xff] %v374_v19  ;;  %v380_v22 = vld [vmem:[#allocation1 + $0x18] sm:$0xff]  ;;  %v382_v23 = vld [vmem:[#allocation1 + $0x20] sm:$0xff] }
  0x1f   :  { %377 = vst [vmem:[%s605_s1 + $0x8] sm:$0xff] %v376_v20  ;;  %379 = vst [vmem:[%s605_s1 + $0x10] sm:$0xff] %v378_v21  ;;  %v384_v24 = vld [vmem:[#allocation1 + $0x28] sm:$0xff]  ;;  %v386_v25 = vld [vmem:[#allocation1 + $0x30] sm:$0xff] }
  0x20   :  { %302 = vst.msk [vmem:[#allocation1 + $0x70] sm:$0xff] %vm105_vm0, %v298_v14  ;;  %308 = vst [vmem:[#allocation1 + $0x78] sm:$0xff] %v307_v17  ;;  %v388_v26 = vld [vmem:[#allocation1 + $0x38] sm:$0xff]  ;;  %v390_v10 = vld [vmem:[#allocation1 + $0x40] sm:$0xff] }
  0x21   :  { %381 = vst [vmem:[%s605_s1 + $0x18] sm:$0xff] %v380_v22  ;;  %383 = vst [vmem:[%s605_s1 + $0x20] sm:$0xff] %v382_v23  ;;  %v392_v27 = vld [vmem:[#allocation1 + $0x48] sm:$0xff]  ;;  %v394_v28 = vld [vmem:[#allocation1 + $0x50] sm:$0xff] }
  0x22   :  { %385 = vst [vmem:[%s605_s1 + $0x28] sm:$0xff] %v384_v24  ;;  %316 = vst.msk [vmem:[#allocation1 + $0x78] sm:$0xff] %vm105_vm0, %v312_v18  ;;  %v396_v29 = vld [vmem:[#allocation1 + $0x58] sm:$0xff] }
  0x23   :  { %387 = vst [vmem:[%s605_s1 + $0x30] sm:$0xff] %v386_v25  ;;  %389 = vst [vmem:[%s605_s1 + $0x38] sm:$0xff] %v388_v26  ;;  %v398_v30 = vld [vmem:[#allocation1 + $0x60] sm:$0xff] }
  0x24   :  { %391 = vst [vmem:[%s605_s1 + $0x40] sm:$0xff] %v390_v10  ;;  %393 = vst [vmem:[%s605_s1 + $0x48] sm:$0xff] %v392_v27  ;;  %v400_v31 = vld [vmem:[#allocation1 + $0x68] sm:$0xff] }
  0x25   :  { %395 = vst [vmem:[%s605_s1 + $0x50] sm:$0xff] %v394_v28  ;;  %397 = vst [vmem:[%s605_s1 + $0x58] sm:$0xff] %v396_v29 }
  0x26   :  { %399 = vst [vmem:[%s605_s1 + $0x60] sm:$0xff] %v398_v30  ;;  %401 = vst [vmem:[%s605_s1 + $0x68] sm:$0xff] %v400_v31 }
  0x27   :  { %v402_v32 = vld [vmem:[#allocation1 + $0x70] sm:$0xff] }
  0x28   :  { %403 = vst [vmem:[%s605_s1 + $0x70] sm:$0xff] %v402_v32 }
  0x29   :  { %v404_v33 = vld [vmem:[#allocation1 + $0x78] sm:$0xff] }
  0x2a   :  { %405 = vst [vmem:[%s605_s1 + $0x78] sm:$0xff] %v404_v33 }

// kernel: spectral_conv2d_forward.1
= control target key start
LH: loop header
LB: loop body
LE: loop exit
PB: predicated region body
PF: predicated region fallthrough
CT: control target
= control target key end

     0   :  { %vm24_vm0 = vcmask 1043456   ;;  %vm20_vm1 = vcmask 64512   ;;  %v2445_v0 = vmov 0.0   ;;  %vm2446_vm2 = vmmov 0   ;;  %s3112_s1 = inlined_call_operand.vmem [shape: bf16[32,8,16], index: 1, kind: input, shape index: {}]   ;;  %s3113_s0 = inlined_call_operand.vmem [shape: bf16[32,16,8], index: 0, kind: input, shape index: {}]   ;;  %s3114_s2 = inlined_call_operand.vmem [shape: f32[32,16,16], index: 2, kind: output, shape index: {}]  }
   0x1   :  { %2219 = vmatprep.subr.bf16.mxu0 %v2445_v0  ;;  %2225 = vmatprep.subr.bf16.mxu1 %v2445_v0  ;;  %v14_v1 = vld [vmem:[%s3112_s1] sm:$0xf]  ;;  %v1940_v2 = vld [vmem:[%s3112_s1 + $0x4] sm:$0xf]  ;;  %v2414_v6 = vld [vmem:[%s3113_s0 + $0x8] sm:$0xff]   ;;  %vm69_vm3 = vcmask 130048  }
   0x2   :  { %v26_v3 = vsel %vm24_vm0, %v14_v1, 0  ;;  %v86_v4 = vsel %vm24_vm0, %v1940_v2, 0  ;;  %2221 = vmatprep.mubr.msk.bf16.mxu0 %vm2446_vm2, %v2445_v0  ;;  %2227 = vmatprep.mubr.msk.bf16.mxu1 %vm2446_vm2, %v2445_v0  ;;  %v2413_v5 = vld [vmem:[%s3113_s0] sm:$0xff]   ;;  %v1947_v7 = vld [vmem:[%s3112_s1 + $0x8] sm:$0xf]  ;;  %v2415_v11 = vld [vmem:[%s3113_s0 + $0x10] sm:$0xff]  }
   0x3   :  { %2220 = vmatpush3.bf16.msra.mxu0 %v26_v3  ;;  %2226 = vmatpush3.bf16.msra.mxu1 %v86_v4  ;;  %v146_v8 = vsel %vm24_vm0, %v1947_v7, 0  ;;  %v1954_v9 = vld [vmem:[%s3112_s1 + $0xc] sm:$0xf]  ;;  %v1961_v12 = vld [vmem:[%s3112_s1 + $0x10] sm:$0xf]  ;;  %v2416_v14 = vld [vmem:[%s3113_s0 + $0x18] sm:$0xff]  }
   0x4   :  { %2231 = vmatprep.subr.bf16.mxu0 %v2445_v0  ;;  %2237 = vmatprep.subr.bf16.mxu1 %v2445_v0  ;;  %v206_v10 = vsel %vm24_vm0, %v1954_v9, 0  ;;  %v1968_v13 = vld [vmem:[%s3112_s1 + $0x14] sm:$0xf]  ;;  %v266_v15 = vsel %vm24_vm0, %v1961_v12, 0  ;;  %v1975_v17 = vld [vmem:[%s3112_s1 + $0x18] sm:$0xf] }
   0x5   :  { %v326_v16 = vsel %vm24_vm0, %v1968_v13, 0  ;;  %v1982_v18 = vld [vmem:[%s3112_s1 + $0x1c] sm:$0xf]  ;;  %v2417_v19 = vld [vmem:[%s3113_s0 + $0x20] sm:$0xff]   ;;  %v2418_v20 = vld [vmem:[%s3113_s0 + $0x28] sm:$0xff]   ;;  %v386_v21 = vsel %vm24_vm0, %v1975_v17, 0 }
   0x6   :  { %2222 = vmatmul.mubr.msk.bf16.vlgmr.msra.gmra.mrb[0].mxu0 %vm20_vm1, %v2413_v5  ;;  %2228 = vmatmul.mubr.msk.bf16.vlgmr.msra.gmra.mrb[0].mxu1 %vm20_vm1, %v2414_v6  ;;  %v446_v22 = vsel %vm24_vm0, %v1982_v18, 0  ;;  %v1989_v23 = vld [vmem:[%s3112_s1 + $0x20] sm:$0xf]  ;;  %v1996_v24 = vld [vmem:[%s3112_s1 + $0x24] sm:$0xf]  ;;  %v2419_v25 = vld [vmem:[%s3113_s0 + $0x30] sm:$0xff]  }
   0x7   :  { %2232 = vmatpush3.bf16.msra.mxu0 %v146_v8  ;;  %2238 = vmatpush3.bf16.msra.mxu1 %v206_v10  ;;  %v2420_v26 = vld [vmem:[%s3113_s0 + $0x38] sm:$0xff]   ;;  %v506_v27 = vsel %vm24_vm0, %v1989_v23, 0  ;;  %v566_v28 = vsel %vm24_vm0, %v1996_v24, 0  ;;  %v2059_v29 = vld [vmem:[%s3112_s1 + $0x48] sm:$0xf]  ;;  %v2421_v37 = vld [vmem:[%s3113_s0 + $0x40] sm:$0xff]  }
   0x8   :  { %2233 = vmatprep.mubr.msk.bf16.mxu0 %vm2446_vm2, %v2445_v0  ;;  %2239 = vmatprep.mubr.msk.bf16.mxu1 %vm2446_vm2, %v2445_v0  ;;  %v2066_v30 = vld [vmem:[%s3112_s1 + $0x4c] sm:$0xf]  ;;  %v2565_v31 = vsel %vm24_vm0, %v2059_v29, 0  ;;  %v2073_v33 = vld [vmem:[%s3112_s1 + $0x50] sm:$0xf]  ;;  %v2424_v58 = vld [vmem:[%s3113_s0 + $0x58] sm:$0xff]  }
   0x9   :  { %2243 = vmatprep.subr.bf16.mxu0 %v2445_v0  ;;  %2249 = vmatprep.subr.bf16.mxu1 %v2445_v0  ;;  %v2568_v32 = vsel %vm24_vm0, %v2066_v30, 0  ;;  %v2080_v34 = vld [vmem:[%s3112_s1 + $0x54] sm:$0xf]  ;;  %v2579_v35 = vsel %vm24_vm0, %v2073_v33, 0  ;;  %v2422_v38 = vld [vmem:[%s3113_s0 + $0x48] sm:$0xff]   ;;  %v2425_v8 = vld [vmem:[%s3113_s0 + $0x60] sm:$0xff]  }
   0xa   :  { %v2582_v36 = vsel %vm24_vm0, %v2080_v34, 0  ;;  %v2003_v39 = vld [vmem:[%s3112_s1 + $0x28] sm:$0xf]  ;;  %v2010_v40 = vld [vmem:[%s3112_s1 + $0x2c] sm:$0xf]  ;;  %v2423_v54 = vld [vmem:[%s3113_s0 + $0x50] sm:$0xff]  }
   0xb   :  { %v2087_v41 = vld [vmem:[%s3112_s1 + $0x58] sm:$0xf]  ;;  %v2094_v42 = vld [vmem:[%s3112_s1 + $0x5c] sm:$0xf]  ;;  %v626_v45 = vsel %vm24_vm0, %v2003_v39, 0  ;;  %v686_v46 = vsel %vm24_vm0, %v2010_v40, 0 }
   0xc   :  { %v2609_v43 = vsel %vm24_vm0, %v2087_v41, 0  ;;  %v2612_v44 = vsel %vm24_vm0, %v2094_v42, 0  ;;  %v2101_v47 = vld [vmem:[%s3112_s1 + $0x60] sm:$0xf]  ;;  %v2108_v48 = vld [vmem:[%s3112_s1 + $0x64] sm:$0xf] }
   0xd   :  { %v2623_v49 = vsel %vm24_vm0, %v2101_v47, 0  ;;  %v2626_v50 = vsel %vm24_vm0, %v2108_v48, 0  ;;  %v2017_v51 = vld [vmem:[%s3112_s1 + $0x30] sm:$0xf]  ;;  %v2115_v52 = vld [vmem:[%s3112_s1 + $0x68] sm:$0xf] }
   0xe   :  { %2234 = vmatmul.mubr.msk.bf16.vlgmr.msra.gmra.mrb[4].mxu0 %vm20_vm1, %v2415_v11  ;;  %2240 = vmatmul.mubr.msk.bf16.vlgmr.msra.gmra.mrb[4].mxu1 %vm20_vm1, %v2416_v14  ;;  %v2122_v53 = vld [vmem:[%s3112_s1 + $0x6c] sm:$0xf]  ;;  %v2647_v55 = vsel %vm24_vm0, %v2115_v52, 0  ;;  %v2024_v57 = vld [vmem:[%s3112_s1 + $0x34] sm:$0xf]  ;;  %v746_v63 = vsel %vm24_vm0, %v2017_v51, 0 }
   0xf   :  { %2244 = vmatpush3.bf16.msra.mxu0 %v266_v15  ;;  %2250 = vmatpush3.bf16.msra.mxu1 %v326_v16  ;;  %v2650_v56 = vsel %vm24_vm0, %v2122_v53, 0  ;;  %v2129_v59 = vld [vmem:[%s3112_s1 + $0x70] sm:$0xf]  ;;  %v2136_v60 = vld [vmem:[%s3112_s1 + $0x74] sm:$0xf]  ;;  %v806_v1 = vsel %vm24_vm0, %v2024_v57, 0 }
  0x10   :  { %2245 = vmatprep.mubr.msk.bf16.mxu0 %vm2446_vm2, %v2445_v0  ;;  %2251 = vmatprep.mubr.msk.bf16.mxu1 %vm2446_vm2, %v2445_v0  ;;  %v2667_v61 = vsel %vm24_vm0, %v2129_v59, 0  ;;  %v2670_v62 = vsel %vm24_vm0, %v2136_v60, 0  ;;  %v2143_v2 = vld [vmem:[%s3112_s1 + $0x78] sm:$0xf]  ;;  %v2150_v3 = vld [vmem:[%s3112_s1 + $0x7c] sm:$0xf] }
  0x11   :  { %2255 = vmatprep.subr.bf16.mxu0 %v2445_v0  ;;  %2261 = vmatprep.subr.bf16.mxu1 %v2445_v0  ;;  %v2683_v4 = vsel %vm24_vm0, %v2143_v2, 0  ;;  %v2686_v5 = vsel %vm24_vm0, %v2150_v3, 0  ;;  %v2031_v6 = vld [vmem:[%s3112_s1 + $0x38] sm:$0xf]  ;;  %v2038_v7 = vld [vmem:[%s3112_s1 + $0x3c] sm:$0xf] }
  0x12   :  { %v2426_v9 = vld [vmem:[%s3113_s0 + $0x68] sm:$0xff]   ;;  %v866_v10 = vsel %vm24_vm0, %v2031_v6, 0  ;;  %v926_v11 = vsel %vm24_vm0, %v2038_v7, 0  ;;  %v2045_v12 = vld [vmem:[%s3112_s1 + $0x40] sm:$0xf]  ;;  %v2427_v14 = vld [vmem:[%s3113_s0 + $0x70] sm:$0xff]  }
  0x13   :  { %v2052_v13 = vld [vmem:[%s3112_s1 + $0x44] sm:$0xf]  ;;  %v2428_v15 = vld [vmem:[%s3113_s0 + $0x78] sm:$0xff]   ;;  %v986_v16 = vsel %vm24_vm0, %v2045_v12, 0  ;;  %v2434_v23 = vld [vmem:[%s3113_s0 + $0xa8] sm:$0xff]  }
  0x14   :  { %v1046_v17 = vsel %vm24_vm0, %v2052_v13, 0  ;;  %v2429_v18 = vld [vmem:[%s3113_s0 + $0x80] sm:$0xff]   ;;  %v2435_v24 = vld [vmem:[%s3113_s0 + $0xb0] sm:$0xff]   ;;  %v2440_v29 = vld [vmem:[%s3113_s0 + $0xd8] sm:$0xff]  }
  0x15   :  { %v2441_v30 = vld [vmem:[%s3113_s0 + $0xe0] sm:$0xff]   ;;  %v2444_v33 = vld [vmem:[%s3113_s0 + $0xf8] sm:$0xff]  }
  0x16   :  { %2246 = vmatmul.mubr.msk.bf16.vlgmr.msra.gmra.mrb[8].mxu0 %vm20_vm1, %v2417_v19  ;;  %2252 = vmatmul.mubr.msk.bf16.vlgmr.msra.gmra.mrb[8].mxu1 %vm20_vm1, %v2418_v20  ;;  %v2430_v19 = vld [vmem:[%s3113_s0 + $0x88] sm:$0xff]   ;;  %v2431_v20 = vld [vmem:[%s3113_s0 + $0x90] sm:$0xff]  }
  0x17   :  { %2256 = vmatpush3.bf16.msra.mxu0 %v386_v21  ;;  %2262 = vmatpush3.bf16.msra.mxu1 %v446_v22  ;;  %v2432_v21 = vld [vmem:[%s3113_s0 + $0x98] sm:$0xff]   ;;  %v2433_v22 = vld [vmem:[%s3113_s0 + $0xa0] sm:$0xff]  }
  0x18   :  { %2257 = vmatprep.mubr.msk.bf16.mxu0 %vm2446_vm2, %v2445_v0  ;;  %2263 = vmatprep.mubr.msk.bf16.mxu1 %vm2446_vm2, %v2445_v0 }
  0x19   :  { %2267 = vmatprep.subr.bf16.mxu0 %v2445_v0  ;;  %2273 = vmatprep.subr.bf16.mxu1 %v2445_v0 }
  0x1e   :  { %2258 = vmatmul.mubr.msk.bf16.vlgmr.msra.gmra.mrb[12].mxu0 %vm20_vm1, %v2419_v25  ;;  %2264 = vmatmul.mubr.msk.bf16.vlgmr.msra.gmra.mrb[12].mxu1 %vm20_vm1, %v2420_v26  ;;  %v2436_v25 = vld [vmem:[%s3113_s0 + $0xb8] sm:$0xff]   ;;  %v2437_v26 = vld [vmem:[%s3113_s0 + $0xc0] sm:$0xff]  }
  0x1f   :  { %2268 = vmatpush3.bf16.msra.mxu0 %v506_v27  ;;  %2274 = vmatpush3.bf16.msra.mxu1 %v566_v28  ;;  %v2438_v27 = vld [vmem:[%s3113_s0 + $0xc8] sm:$0xff]   ;;  %v2439_v28 = vld [vmem:[%s3113_s0 + $0xd0] sm:$0xff]  }
  0x20   :  { %2269 = vmatprep.mubr.msk.bf16.mxu0 %vm2446_vm2, %v2445_v0  ;;  %2275 = vmatprep.mubr.msk.bf16.mxu1 %vm2446_vm2, %v2445_v0 }
  0x21   :  { %2279 = vmatprep.subr.bf16.mxu0 %v2445_v0  ;;  %2285 = vmatprep.subr.bf16.mxu1 %v2445_v0 }
  0x26   :  { %2270 = vmatmul.mubr.msk.bf16.vlgmr.msra.gmra.mrb[16].mxu0 %vm20_vm1, %v2421_v37  ;;  %2276 = vmatmul.mubr.msk.bf16.vlgmr.msra.gmra.mrb[16].mxu1 %vm20_vm1, %v2422_v38 }
  0x27   :  { %2280 = vmatpush3.bf16.msra.mxu0 %v626_v45  ;;  %2286 = vmatpush3.bf16.msra.mxu1 %v686_v46 }
  0x28   :  { %2281 = vmatprep.mubr.msk.bf16.mxu0 %vm2446_vm2, %v2445_v0  ;;  %2287 = vmatprep.mubr.msk.bf16.mxu1 %vm2446_vm2, %v2445_v0 }
  0x29   :  { %2291 = vmatprep.subr.bf16.mxu0 %v2445_v0  ;;  %2297 = vmatprep.subr.bf16.mxu1 %v2445_v0 }
  0x2e   :  { %2282 = vmatmul.mubr.msk.bf16.vlgmr.msra.gmra.mrb[20].mxu0 %vm20_vm1, %v2423_v54  ;;  %2288 = vmatmul.mubr.msk.bf16.vlgmr.msra.gmra.mrb[20].mxu1 %vm20_vm1, %v2424_v58 }
  0x2f   :  { %2292 = vmatpush3.bf16.msra.mxu0 %v746_v63  ;;  %2298 = vmatpush3.bf16.msra.mxu1 %v806_v1 }
  0x30   :  { %2293 = vmatprep.mubr.msk.bf16.mxu0 %vm2446_vm2, %v2445_v0  ;;  %2299 = vmatprep.mubr.msk.bf16.mxu1 %vm2446_vm2, %v2445_v0 }
  0x31   :  { %2303 = vmatprep.subr.bf16.mxu0 %v2445_v0  ;;  %2309 = vmatprep.subr.bf16.mxu1 %v2445_v0 }
  0x36   :  { %2294 = vmatmul.mubr.msk.bf16.vlgmr.msra.gmra.mrb[24].mxu0 %vm20_vm1, %v2425_v8  ;;  %2300 = vmatmul.mubr.msk.bf16.vlgmr.msra.gmra.mrb[24].mxu1 %vm20_vm1, %v2426_v9 }
  0x37   :  { %2304 = vmatpush3.bf16.msra.mxu0 %v866_v10  ;;  %2310 = vmatpush3.bf16.msra.mxu1 %v926_v11 }
  0x38   :  { %2305 = vmatprep.mubr.msk.bf16.mxu0 %vm2446_vm2, %v2445_v0  ;;  %2311 = vmatprep.mubr.msk.bf16.mxu1 %vm2446_vm2, %v2445_v0 }
  0x39   :  { %2315 = vmatprep.subr.bf16.mxu0 %v2445_v0  ;;  %2321 = vmatprep.subr.bf16.mxu1 %v2445_v0 }
  0x3e   :  { %2306 = vmatmul.mubr.msk.bf16.vlgmr.msra.gmra.mrb[28].mxu0 %vm20_vm1, %v2427_v14  ;;  %2312 = vmatmul.mubr.msk.bf16.vlgmr.msra.gmra.mrb[28].mxu1 %vm20_vm1, %v2428_v15 }
  0x3f   :  { %2316 = vmatpush3.bf16.msra.mxu0 %v986_v16  ;;  %2322 = vmatpush3.bf16.msra.mxu1 %v1046_v17 }
  0x40   :  { %2317 = vmatprep.mubr.msk.bf16.mxu0 %vm2446_vm2, %v2445_v0  ;;  %2323 = vmatprep.mubr.msk.bf16.mxu1 %vm2446_vm2, %v2445_v0 }
  0x41   :  { %2327 = vmatprep.subr.bf16.mxu0 %v2445_v0  ;;  %2333 = vmatprep.subr.bf16.mxu1 %v2445_v0 }
  0x46   :  { %2318 = vmatmul.mubr.msk.bf16.vlgmr.msra.gmra.mrb[32].mxu0 %vm20_vm1, %v2429_v18  ;;  %2324 = vmatmul.mubr.msk.bf16.vlgmr.msra.gmra.mrb[32].mxu1 %vm20_vm1, %v2430_v19 }
  0x47   :  { %2328 = vmatpush3.bf16.msra.mxu0 %v2565_v31  ;;  %2334 = vmatpush3.bf16.msra.mxu1 %v2568_v32  ;;  %v2442_v31 = vld [vmem:[%s3113_s0 + $0xe8] sm:$0xff]   ;;  %v2443_v32 = vld [vmem:[%s3113_s0 + $0xf0] sm:$0xff]  }
  0x48   :  { %2329 = vmatprep.mubr.msk.bf16.mxu0 %vm2446_vm2, %v2445_v0  ;;  %2335 = vmatprep.mubr.msk.bf16.mxu1 %vm2446_vm2, %v2445_v0 }
  0x49   :  { %2339 = vmatprep.subr.bf16.mxu0 %v2445_v0  ;;  %2345 = vmatprep.subr.bf16.mxu1 %v2445_v0 }
  0x4e   :  { %2330 = vmatmul.mubr.msk.bf16.vlgmr.msra.gmra.mrb[36].mxu0 %vm20_vm1, %v2431_v20  ;;  %2336 = vmatmul.mubr.msk.bf16.vlgmr.msra.gmra.mrb[36].mxu1 %vm20_vm1, %v2432_v21 }
  0x4f   :  { %2340 = vmatpush3.bf16.msra.mxu0 %v2579_v35  ;;  %2346 = vmatpush3.bf16.msra.mxu1 %v2582_v36 }
  0x50   :  { %2341 = vmatprep.mubr.msk.bf16.mxu0 %vm2446_vm2, %v2445_v0  ;;  %2347 = vmatprep.mubr.msk.bf16.mxu1 %vm2446_vm2, %v2445_v0 }
  0x51   :  { %2351 = vmatprep.subr.bf16.mxu0 %v2445_v0  ;;  %2357 = vmatprep.subr.bf16.mxu1 %v2445_v0 }
  0x56   :  { %2342 = vmatmul.mubr.msk.bf16.vlgmr.msra.gmra.mrb[40].mxu0 %vm20_vm1, %v2433_v22  ;;  %2348 = vmatmul.mubr.msk.bf16.vlgmr.msra.gmra.mrb[40].mxu1 %vm20_vm1, %v2434_v23 }
  0x57   :  { %2352 = vmatpush3.bf16.msra.mxu0 %v2609_v43  ;;  %2358 = vmatpush3.bf16.msra.mxu1 %v2612_v44 }
  0x58   :  { %2353 = vmatprep.mubr.msk.bf16.mxu0 %vm2446_vm2, %v2445_v0  ;;  %2359 = vmatprep.mubr.msk.bf16.mxu1 %vm2446_vm2, %v2445_v0 }
  0x59   :  { %2363 = vmatprep.subr.bf16.mxu0 %v2445_v0  ;;  %2369 = vmatprep.subr.bf16.mxu1 %v2445_v0 }
  0x5e   :  { %2354 = vmatmul.mubr.msk.bf16.vlgmr.msra.gmra.mrb[44].mxu0 %vm20_vm1, %v2435_v24  ;;  %2360 = vmatmul.mubr.msk.bf16.vlgmr.msra.gmra.mrb[44].mxu1 %vm20_vm1, %v2436_v25 }
  0x5f   :  { %2364 = vmatpush3.bf16.msra.mxu0 %v2623_v49  ;;  %2370 = vmatpush3.bf16.msra.mxu1 %v2626_v50 }
  0x60   :  { %2365 = vmatprep.mubr.msk.bf16.mxu0 %vm2446_vm2, %v2445_v0  ;;  %2371 = vmatprep.mubr.msk.bf16.mxu1 %vm2446_vm2, %v2445_v0 }
  0x61   :  { %2375 = vmatprep.subr.bf16.mxu0 %v2445_v0  ;;  %2381 = vmatprep.subr.bf16.mxu1 %v2445_v0 }
  0x66   :  { %2366 = vmatmul.mubr.msk.bf16.vlgmr.msra.gmra.mrb[48].mxu0 %vm20_vm1, %v2437_v26  ;;  %2372 = vmatmul.mubr.msk.bf16.vlgmr.msra.gmra.mrb[48].mxu1 %vm20_vm1, %v2438_v27 }
  0x67   :  { %2376 = vmatpush3.bf16.msra.mxu0 %v2647_v55  ;;  %2382 = vmatpush3.bf16.msra.mxu1 %v2650_v56 }
  0x68   :  { %2377 = vmatprep.mubr.msk.bf16.mxu0 %vm2446_vm2, %v2445_v0  ;;  %2383 = vmatprep.mubr.msk.bf16.mxu1 %vm2446_vm2, %v2445_v0 }
  0x69   :  { %2387 = vmatprep.subr.bf16.mxu0 %v2445_v0  ;;  %2393 = vmatprep.subr.bf16.mxu1 %v2445_v0 }
  0x6e   :  { %2378 = vmatmul.mubr.msk.bf16.vlgmr.msra.gmra.mrb[52].mxu0 %vm20_vm1, %v2439_v28  ;;  %2384 = vmatmul.mubr.msk.bf16.vlgmr.msra.gmra.mrb[52].mxu1 %vm20_vm1, %v2440_v29 }
  0x6f   :  { %2388 = vmatpush3.bf16.msra.mxu0 %v2667_v61  ;;  %2394 = vmatpush3.bf16.msra.mxu1 %v2670_v62 }
  0x70   :  { %2389 = vmatprep.mubr.msk.bf16.mxu0 %vm2446_vm2, %v2445_v0  ;;  %2395 = vmatprep.mubr.msk.bf16.mxu1 %vm2446_vm2, %v2445_v0 }
  0x71   :  { %2399 = vmatprep.subr.bf16.mxu0 %v2445_v0  ;;  %2405 = vmatprep.subr.bf16.mxu1 %v2445_v0 }
  0x76   :  { %2390 = vmatmul.mubr.msk.bf16.vlgmr.msra.gmra.mrb[56].mxu0 %vm20_vm1, %v2441_v30  ;;  %2396 = vmatmul.mubr.msk.bf16.vlgmr.msra.gmra.mrb[56].mxu1 %vm20_vm1, %v2442_v31 }
  0x77   :  { %2400 = vmatpush3.bf16.msra.mxu0 %v2683_v4  ;;  %2406 = vmatpush3.bf16.msra.mxu1 %v2686_v5 }
  0x78   :  { %2401 = vmatprep.mubr.msk.bf16.mxu0 %vm2446_vm2, %v2445_v0  ;;  %2407 = vmatprep.mubr.msk.bf16.mxu1 %vm2446_vm2, %v2445_v0 }
  0x7e   :  { %2402 = vmatmul.mubr.msk.bf16.vlgmr.msra.gmra.mrb[60].mxu0 %vm20_vm1, %v2443_v32  ;;  %2408 = vmatmul.mubr.msk.bf16.vlgmr.msra.gmra.mrb[60].mxu1 %vm20_vm1, %v2444_v33 }
  0xd9   :  { %v62_v34 = vpop.f32.mrb[0].mxu0  ;;  %v122_v35 = vpop.f32.mrb[0].mxu1 }
  0xda   :  { %70 = vst.msk [vmem:[%s3114_s2] sm:$0xff] %vm69_vm3, %v62_v34  ;;  %1943 = vst.msk [vmem:[%s3114_s2 + $0x10] sm:$0xff] %vm69_vm3, %v122_v35  ;;  %v2223_v0 = vpop.f32.mrb[1].mxu0  ;;  %v2229_v36 = vpop.f32.mrb[1].mxu1 }
  0xdb   :  { %v65_v37 = vpop.f32.mrb[2].mxu0  ;;  %v125_v38 = vpop.f32.mrb[2].mxu1 }
  0xdc   :  { %71 = vst.msk [vmem:[%s3114_s2 + $0x8] sm:$0xff] %vm69_vm3, %v65_v37  ;;  %1944 = vst.msk [vmem:[%s3114_s2 + $0x18] sm:$0xff] %vm69_vm3, %v125_v38  ;;  %v2224_v39 = vpop.f32.mrb[3].mxu0  ;;  %v2230_v40 = vpop.f32.mrb[3].mxu1 }
  0xe1   :  { %v182_v41 = vpop.f32.mrb[4].mxu0  ;;  %v242_v42 = vpop.f32.mrb[4].mxu1 }
  0xe2   :  { %1950 = vst.msk [vmem:[%s3114_s2 + $0x20] sm:$0xff] %vm69_vm3, %v182_v41  ;;  %1957 = vst.msk [vmem:[%s3114_s2 + $0x30] sm:$0xff] %vm69_vm3, %v242_v42  ;;  %v2235_v43 = vpop.f32.mrb[5].mxu0  ;;  %v2241_v44 = vpop.f32.mrb[5].mxu1 }
  0xe3   :  { %v185_v45 = vpop.f32.mrb[6].mxu0  ;;  %v245_v46 = vpop.f32.mrb[6].mxu1 }
  0xe4   :  { %1951 = vst.msk [vmem:[%s3114_s2 + $0x28] sm:$0xff] %vm69_vm3, %v185_v45  ;;  %1958 = vst.msk [vmem:[%s3114_s2 + $0x38] sm:$0xff] %vm69_vm3, %v245_v46  ;;  %v2236_v47 = vpop.f32.mrb[7].mxu0  ;;  %v2242_v48 = vpop.f32.mrb[7].mxu1 }
  0xe9   :  { %v302_v49 = vpop.f32.mrb[8].mxu0  ;;  %v362_v50 = vpop.f32.mrb[8].mxu1 }
  0xea   :  { %1964 = vst.msk [vmem:[%s3114_s2 + $0x40] sm:$0xff] %vm69_vm3, %v302_v49  ;;  %1971 = vst.msk [vmem:[%s3114_s2 + $0x50] sm:$0xff] %vm69_vm3, %v362_v50  ;;  %v2247_v51 = vpop.f32.mrb[9].mxu0  ;;  %v2253_v52 = vpop.f32.mrb[9].mxu1 }
  0xeb   :  { %v305_v53 = vpop.f32.mrb[10].mxu0  ;;  %v365_v54 = vpop.f32.mrb[10].mxu1 }
  0xec   :  { %1965 = vst.msk [vmem:[%s3114_s2 + $0x48] sm:$0xff] %vm69_vm3, %v305_v53  ;;  %1972 = vst.msk [vmem:[%s3114_s2 + $0x58] sm:$0xff] %vm69_vm3, %v365_v54  ;;  %v2248_v55 = vpop.f32.mrb[11].mxu0  ;;  %v2254_v56 = vpop.f32.mrb[11].mxu1 }
  0xf1   :  { %v422_v57 = vpop.f32.mrb[12].mxu0  ;;  %v482_v58 = vpop.f32.mrb[12].mxu1 }
  0xf2   :  { %1978 = vst.msk [vmem:[%s3114_s2 + $0x60] sm:$0xff] %vm69_vm3, %v422_v57  ;;  %1985 = vst.msk [vmem:[%s3114_s2 + $0x70] sm:$0xff] %vm69_vm3, %v482_v58  ;;  %v2259_v59 = vpop.f32.mrb[13].mxu0  ;;  %v2265_v60 = vpop.f32.mrb[13].mxu1 }
  0xf3   :  { %v425_v61 = vpop.f32.mrb[14].mxu0  ;;  %v485_v62 = vpop.f32.mrb[14].mxu1 }
  0xf4   :  { %1979 = vst.msk [vmem:[%s3114_s2 + $0x68] sm:$0xff] %vm69_vm3, %v425_v61  ;;  %1986 = vst.msk [vmem:[%s3114_s2 + $0x78] sm:$0xff] %vm69_vm3, %v485_v62  ;;  %v2260_v63 = vpop.f32.mrb[15].mxu0  ;;  %v2266_v1 = vpop.f32.mrb[15].mxu1 }
  0xf9   :  { %v542_v2 = vpop.f32.mrb[16].mxu0  ;;  %v602_v3 = vpop.f32.mrb[16].mxu1 }
  0xfa   :  { %1992 = vst.msk [vmem:[%s3114_s2 + $0x80] sm:$0xff] %vm69_vm3, %v542_v2  ;;  %1999 = vst.msk [vmem:[%s3114_s2 + $0x90] sm:$0xff] %vm69_vm3, %v602_v3  ;;  %v2271_v4 = vpop.f32.mrb[17].mxu0  ;;  %v2277_v5 = vpop.f32.mrb[17].mxu1 }
  0xfb   :  { %v545_v6 = vpop.f32.mrb[18].mxu0  ;;  %v605_v7 = vpop.f32.mrb[18].mxu1 }
  0xfc   :  { %1993 = vst.msk [vmem:[%s3114_s2 + $0x88] sm:$0xff] %vm69_vm3, %v545_v6  ;;  %2000 = vst.msk [vmem:[%s3114_s2 + $0x98] sm:$0xff] %vm69_vm3, %v605_v7  ;;  %v2272_v8 = vpop.f32.mrb[19].mxu0  ;;  %v2278_v9 = vpop.f32.mrb[19].mxu1 }
 0x101   :  { %v662_v10 = vpop.f32.mrb[20].mxu0  ;;  %v722_v11 = vpop.f32.mrb[20].mxu1 }
 0x102   :  { %2006 = vst.msk [vmem:[%s3114_s2 + $0xa0] sm:$0xff] %vm69_vm3, %v662_v10  ;;  %2013 = vst.msk [vmem:[%s3114_s2 + $0xb0] sm:$0xff] %vm69_vm3, %v722_v11  ;;  %v2283_v12 = vpop.f32.mrb[21].mxu0  ;;  %v2289_v13 = vpop.f32.mrb[21].mxu1 }
 0x103   :  { %v665_v14 = vpop.f32.mrb[22].mxu0  ;;  %v725_v15 = vpop.f32.mrb[22].mxu1 }
 0x104   :  { %2007 = vst.msk [vmem:[%s3114_s2 + $0xa8] sm:$0xff] %vm69_vm3, %v665_v14  ;;  %2014 = vst.msk [vmem:[%s3114_s2 + $0xb8] sm:$0xff] %vm69_vm3, %v725_v15  ;;  %v2284_v16 = vpop.f32.mrb[23].mxu0  ;;  %v2290_v17 = vpop.f32.mrb[23].mxu1 }
 0x109   :  { %v782_v18 = vpop.f32.mrb[24].mxu0  ;;  %v842_v19 = vpop.f32.mrb[24].mxu1 }
 0x10a   :  { %2020 = vst.msk [vmem:[%s3114_s2 + $0xc0] sm:$0xff] %vm69_vm3, %v782_v18  ;;  %2027 = vst.msk [vmem:[%s3114_s2 + $0xd0] sm:$0xff] %vm69_vm3, %v842_v19  ;;  %v2295_v20 = vpop.f32.mrb[25].mxu0  ;;  %v2301_v21 = vpop.f32.mrb[25].mxu1 }
 0x10b   :  { %v785_v22 = vpop.f32.mrb[26].mxu0  ;;  %v845_v23 = vpop.f32.mrb[26].mxu1 }
 0x10c   :  { %2021 = vst.msk [vmem:[%s3114_s2 + $0xc8] sm:$0xff] %vm69_vm3, %v785_v22  ;;  %2028 = vst.msk [vmem:[%s3114_s2 + $0xd8] sm:$0xff] %vm69_vm3, %v845_v23  ;;  %v2296_v24 = vpop.f32.mrb[27].mxu0  ;;  %v2302_v25 = vpop.f32.mrb[27].mxu1 }
 0x111   :  { %v902_v26 = vpop.f32.mrb[28].mxu0  ;;  %v962_v27 = vpop.f32.mrb[28].mxu1 }
 0x112   :  { %2034 = vst.msk [vmem:[%s3114_s2 + $0xe0] sm:$0xff] %vm69_vm3, %v902_v26  ;;  %2041 = vst.msk [vmem:[%s3114_s2 + $0xf0] sm:$0xff] %vm69_vm3, %v962_v27  ;;  %v2307_v28 = vpop.f32.mrb[29].mxu0  ;;  %v2313_v29 = vpop.f32.mrb[29].mxu1 }
 0x113   :  { %v905_v30 = vpop.f32.mrb[30].mxu0  ;;  %v965_v31 = vpop.f32.mrb[30].mxu1 }
 0x114   :  { %2035 = vst.msk [vmem:[%s3114_s2 + $0xe8] sm:$0xff] %vm69_vm3, %v905_v30  ;;  %2042 = vst.msk [vmem:[%s3114_s2 + $0xf8] sm:$0xff] %vm69_vm3, %v965_v31  ;;  %v2308_v32 = vpop.f32.mrb[31].mxu0  ;;  %v2314_v33 = vpop.f32.mrb[31].mxu1 }
 0x119   :  { %v1022_v34 = vpop.f32.mrb[32].mxu0  ;;  %v1082_v35 = vpop.f32.mrb[32].mxu1 }
 0x11a   :  { %2048 = vst.msk [vmem:[%s3114_s2 + $0x100] sm:$0xff] %vm69_vm3, %v1022_v34  ;;  %2055 = vst.msk [vmem:[%s3114_s2 + $0x110] sm:$0xff] %vm69_vm3, %v1082_v35  ;;  %v2319_v0 = vpop.f32.mrb[33].mxu0  ;;  %v2325_v36 = vpop.f32.mrb[33].mxu1 }
 0x11b   :  { %v1025_v37 = vpop.f32.mrb[34].mxu0  ;;  %v1085_v38 = vpop.f32.mrb[34].mxu1 }
 0x11c   :  { %2049 = vst.msk [vmem:[%s3114_s2 + $0x108] sm:$0xff] %vm69_vm3, %v1025_v37  ;;  %2056 = vst.msk [vmem:[%s3114_s2 + $0x118] sm:$0xff] %vm69_vm3, %v1085_v38  ;;  %v2320_v39 = vpop.f32.mrb[35].mxu0  ;;  %v2326_v40 = vpop.f32.mrb[35].mxu1 }
 0x121   :  { %v1142_v41 = vpop.f32.mrb[36].mxu0  ;;  %v1202_v42 = vpop.f32.mrb[36].mxu1 }
 0x122   :  { %2062 = vst.msk [vmem:[%s3114_s2 + $0x120] sm:$0xff] %vm69_vm3, %v1142_v41  ;;  %2069 = vst.msk [vmem:[%s3114_s2 + $0x130] sm:$0xff] %vm69_vm3, %v1202_v42  ;;  %v2331_v43 = vpop.f32.mrb[37].mxu0  ;;  %v2337_v44 = vpop.f32.mrb[37].mxu1 }
 0x123   :  { %v1145_v45 = vpop.f32.mrb[38].mxu0  ;;  %v1205_v46 = vpop.f32.mrb[38].mxu1 }
 0x124   :  { %2063 = vst.msk [vmem:[%s3114_s2 + $0x128] sm:$0xff] %vm69_vm3, %v1145_v45  ;;  %2070 = vst.msk [vmem:[%s3114_s2 + $0x138] sm:$0xff] %vm69_vm3, %v1205_v46  ;;  %v2332_v47 = vpop.f32.mrb[39].mxu0  ;;  %v2338_v48 = vpop.f32.mrb[39].mxu1 }
 0x129   :  { %v1262_v49 = vpop.f32.mrb[40].mxu0  ;;  %v1322_v50 = vpop.f32.mrb[40].mxu1 }
 0x12a   :  { %2076 = vst.msk [vmem:[%s3114_s2 + $0x140] sm:$0xff] %vm69_vm3, %v1262_v49  ;;  %2083 = vst.msk [vmem:[%s3114_s2 + $0x150] sm:$0xff] %vm69_vm3, %v1322_v50  ;;  %v2343_v51 = vpop.f32.mrb[41].mxu0  ;;  %v2349_v52 = vpop.f32.mrb[41].mxu1 }
 0x12b   :  { %v1265_v53 = vpop.f32.mrb[42].mxu0  ;;  %v1325_v54 = vpop.f32.mrb[42].mxu1 }
 0x12c   :  { %2077 = vst.msk [vmem:[%s3114_s2 + $0x148] sm:$0xff] %vm69_vm3, %v1265_v53  ;;  %2084 = vst.msk [vmem:[%s3114_s2 + $0x158] sm:$0xff] %vm69_vm3, %v1325_v54  ;;  %v2344_v55 = vpop.f32.mrb[43].mxu0  ;;  %v2350_v56 = vpop.f32.mrb[43].mxu1 }
 0x131   :  { %v1382_v57 = vpop.f32.mrb[44].mxu0  ;;  %v1442_v58 = vpop.f32.mrb[44].mxu1 }
 0x132   :  { %2090 = vst.msk [vmem:[%s3114_s2 + $0x160] sm:$0xff] %vm69_vm3, %v1382_v57  ;;  %2097 = vst.msk [vmem:[%s3114_s2 + $0x170] sm:$0xff] %vm69_vm3, %v1442_v58  ;;  %v2355_v59 = vpop.f32.mrb[45].mxu0  ;;  %v2361_v60 = vpop.f32.mrb[45].mxu1 }
 0x133   :  { %v1385_v61 = vpop.f32.mrb[46].mxu0  ;;  %v1445_v62 = vpop.f32.mrb[46].mxu1 }
 0x134   :  { %2091 = vst.msk [vmem:[%s3114_s2 + $0x168] sm:$0xff] %vm69_vm3, %v1385_v61  ;;  %2098 = vst.msk [vmem:[%s3114_s2 + $0x178] sm:$0xff] %vm69_vm3, %v1445_v62  ;;  %v2356_v63 = vpop.f32.mrb[47].mxu0  ;;  %v2362_v1 = vpop.f32.mrb[47].mxu1 }
 0x139   :  { %v1502_v2 = vpop.f32.mrb[48].mxu0  ;;  %v1562_v3 = vpop.f32.mrb[48].mxu1 }
 0x13a   :  { %2104 = vst.msk [vmem:[%s3114_s2 + $0x180] sm:$0xff] %vm69_vm3, %v1502_v2  ;;  %2111 = vst.msk [vmem:[%s3114_s2 + $0x190] sm:$0xff] %vm69_vm3, %v1562_v3  ;;  %v2367_v4 = vpop.f32.mrb[49].mxu0  ;;  %v2373_v5 = vpop.f32.mrb[49].mxu1 }
 0x13b   :  { %v1505_v6 = vpop.f32.mrb[50].mxu0  ;;  %v1565_v7 = vpop.f32.mrb[50].mxu1 }
 0x13c   :  { %2105 = vst.msk [vmem:[%s3114_s2 + $0x188] sm:$0xff] %vm69_vm3, %v1505_v6  ;;  %2112 = vst.msk [vmem:[%s3114_s2 + $0x198] sm:$0xff] %vm69_vm3, %v1565_v7  ;;  %v2368_v8 = vpop.f32.mrb[51].mxu0  ;;  %v2374_v9 = vpop.f32.mrb[51].mxu1 }
 0x141   :  { %v1622_v10 = vpop.f32.mrb[52].mxu0  ;;  %v1682_v11 = vpop.f32.mrb[52].mxu1 }
 0x142   :  { %2118 = vst.msk [vmem:[%s3114_s2 + $0x1a0] sm:$0xff] %vm69_vm3, %v1622_v10  ;;  %2125 = vst.msk [vmem:[%s3114_s2 + $0x1b0] sm:$0xff] %vm69_vm3, %v1682_v11  ;;  %v2379_v12 = vpop.f32.mrb[53].mxu0  ;;  %v2385_v13 = vpop.f32.mrb[53].mxu1 }
 0x143   :  { %v1625_v14 = vpop.f32.mrb[54].mxu0  ;;  %v1685_v15 = vpop.f32.mrb[54].mxu1 }
 0x144   :  { %2119 = vst.msk [vmem:[%s3114_s2 + $0x1a8] sm:$0xff] %vm69_vm3, %v1625_v14  ;;  %2126 = vst.msk [vmem:[%s3114_s2 + $0x1b8] sm:$0xff] %vm69_vm3, %v1685_v15  ;;  %v2380_v16 = vpop.f32.mrb[55].mxu0  ;;  %v2386_v17 = vpop.f32.mrb[55].mxu1 }
 0x149   :  { %v1742_v18 = vpop.f32.mrb[56].mxu0  ;;  %v1802_v19 = vpop.f32.mrb[56].mxu1 }
 0x14a   :  { %2132 = vst.msk [vmem:[%s3114_s2 + $0x1c0] sm:$0xff] %vm69_vm3, %v1742_v18  ;;  %2139 = vst.msk [vmem:[%s3114_s2 + $0x1d0] sm:$0xff] %vm69_vm3, %v1802_v19  ;;  %v2391_v20 = vpop.f32.mrb[57].mxu0  ;;  %v2397_v21 = vpop.f32.mrb[57].mxu1 }
 0x14b   :  { %v1745_v22 = vpop.f32.mrb[58].mxu0  ;;  %v1805_v23 = vpop.f32.mrb[58].mxu1 }
 0x14c   :  { %2133 = vst.msk [vmem:[%s3114_s2 + $0x1c8] sm:$0xff] %vm69_vm3, %v1745_v22  ;;  %2140 = vst.msk [vmem:[%s3114_s2 + $0x1d8] sm:$0xff] %vm69_vm3, %v1805_v23  ;;  %v2392_v24 = vpop.f32.mrb[59].mxu0  ;;  %v2398_v25 = vpop.f32.mrb[59].mxu1 }
 0x151   :  { %v1862_v26 = vpop.f32.mrb[60].mxu0  ;;  %v1922_v27 = vpop.f32.mrb[60].mxu1 }
 0x152   :  { %2146 = vst.msk [vmem:[%s3114_s2 + $0x1e0] sm:$0xff] %vm69_vm3, %v1862_v26  ;;  %2153 = vst.msk [vmem:[%s3114_s2 + $0x1f0] sm:$0xff] %vm69_vm3, %v1922_v27  ;;  %v2403_v28 = vpop.f32.mrb[61].mxu0  ;;  %v2409_v29 = vpop.f32.mrb[61].mxu1 }
 0x153   :  { %v1865_v30 = vpop.f32.mrb[62].mxu0  ;;  %v1925_v31 = vpop.f32.mrb[62].mxu1 }
 0x154   :  { %2147 = vst.msk [vmem:[%s3114_s2 + $0x1e8] sm:$0xff] %vm69_vm3, %v1865_v30  ;;  %2154 = vst.msk [vmem:[%s3114_s2 + $0x1f8] sm:$0xff] %vm69_vm3, %v1925_v31  ;;  %v2404_v32 = vpop.f32.mrb[63].mxu0  ;;  %v2410_v33 = vpop.f32.mrb[63].mxu1 }

</bundles_post_ra>
